<compile_context>
chip_gen: v5e
topology: v5e:2x2
jax: 0.10.0
libtpu: 0.0.40
codegen_flags: <defaults>
</compile_context>

<pallas_src>
import functools
import math

import jax
import jax.numpy as jnp
from jax.experimental import pallas as pl
from jax.experimental.pallas import tpu as pltpu


# ----------------------------- small test config ---------------------------
HIDDEN = 128            # config.hidden_size          (multiple of 128 -> lane dense)
INTERMEDIATE = 256      # config.intermediate_size
NUM_LAYERS = 2          # config.num_hidden_layers
NUM_HEADS = 4           # config.num_attention_heads
HEAD_DIM = HIDDEN // NUM_HEADS
CHANNELS = 3            # config.num_channels
IMAGE = 32              # config.image_size
PATCH = 8               # config.patch_size
SEQ = (IMAGE // PATCH) ** 2          # num_patches = num image tokens = 16
BATCH = 2
LN_EPS = 1e-6
SCALE = HEAD_DIM ** (-0.5)
_GELU_C = math.sqrt(2.0 / math.pi)


# ------------------------------ Pallas kernel ------------------------------
def _siglip_kernel(
    # constant-index inputs (fetched once, stay resident)
    patches_ref, wp_ref, bp_ref, pos_ref,
    # per-layer stacked params (streamed, index_map = l, double-buffered)
    ln1g_ref, ln1b_ref, wqkv_ref, bqkv_ref, woh_ref, bo_ref,
    ln2g_ref, ln2b_ref, w1_ref, b1_ref, w2_ref, b2_ref,
    # constant-index post-LayerNorm params
    plng_ref, plnb_ref,
    # output + VMEM carry
    o_ref, h_ref,
    *, batch, seq, heads, head_dim, hidden, scale, eps,
):
    l = pl.program_id(0)
    last = pl.num_programs(0) - 1
    D = hidden

    def layer_norm(v, g, b):
        mu = jnp.mean(v, axis=-1, keepdims=True)
        var = jnp.mean((v - mu) ** 2, axis=-1, keepdims=True)
        return (v - mu) * jax.lax.rsqrt(var + eps) * g + b

    # ---- step 0: patch embedding (stride=kernel conv == matmul) + position embedding ----
    @pl.when(l == 0)
    def _():
        pe = jnp.dot(patches_ref[...].astype(jnp.bfloat16), wp_ref[...],
                     preferred_element_type=jnp.float32) + bp_ref[...]
        h_ref[...] = pe + jnp.tile(pos_ref[...], (batch, 1))

    x = h_ref[...]                                               # (B*S, D) f32 carry

    # ---- LayerNorm 1 + fused QKV projection (bf16 operands, f32 accumulate) ----
    h1 = layer_norm(x, ln1g_ref[0], ln1b_ref[0])
    qkv = jnp.dot(h1.astype(jnp.bfloat16), wqkv_ref[0],
                  preferred_element_type=jnp.float32) + bqkv_ref[0]   # (B*S, 3D)
    q = qkv[:, 0:D]
    k = qkv[:, D:2 * D]
    v = qkv[:, 2 * D:3 * D]

    woh = woh_ref[0]                                             # (H, hd, D) bf16
    attn_parts = []
    for b in range(batch):                                       # B=2: fully unrolled
        r = b * seq

        def to_heads(t):
            # rows of batch b: (S, D) -> (H, S, hd) with heads as the batch axis
            return jnp.stack(
                [t[r:r + seq, j * head_dim:(j + 1) * head_dim] for j in range(heads)],
                axis=0).astype(jnp.bfloat16)

        qh, kh, vh = to_heads(q), to_heads(k), to_heads(v)
        s = jnp.einsum("hqd,hkd->hqk", qh, kh,
                       preferred_element_type=jnp.float32) * scale     # (H, S, S) f32
        s = s - jnp.max(s, axis=-1, keepdims=True)
        p = jnp.exp(s)
        p = p * pl.reciprocal(jnp.sum(p, axis=-1, keepdims=True), approx=True)
        ctx = jnp.einsum("hqk,hkd->hqd", p.astype(jnp.bfloat16), vh,
                         preferred_element_type=jnp.float32)           # (H, S, hd)
        # head-major output projection; sum over heads == concat(heads) @ Wo
        proj = jnp.einsum("hqd,hdf->hqf", ctx.astype(jnp.bfloat16), woh,
                          preferred_element_type=jnp.float32)          # (H, S, D)
        attn_parts.append(jnp.sum(proj, axis=0))                       # (S, D)
    attn = jnp.concatenate(attn_parts, axis=0) + bo_ref[0]             # (B*S, D) (sublane cat)

    x1 = x + attn                                                      # residual 1

    # ---- LayerNorm 2 + MLP (tanh-approximate GELU; tanh -> EUP slot) ----
    h2 = layer_norm(x1, ln2g_ref[0], ln2b_ref[0])
    f = jnp.dot(h2.astype(jnp.bfloat16), w1_ref[0],
                preferred_element_type=jnp.float32) + b1_ref[0]        # (B*S, I)
    f = 0.5 * f * (1.0 + jnp.tanh(_GELU_C * (f + 0.044715 * f * f * f)))
    g = jnp.dot(f.astype(jnp.bfloat16), w2_ref[0],
                preferred_element_type=jnp.float32) + b2_ref[0]        # (B*S, D)
    y = x1 + g                                                         # residual 2

    @pl.when(l < last)
    def _():
        h_ref[...] = y                                                 # carry to next layer

    @pl.when(l == last)
    def _():
        # SiglipVisionTransformer.post_layernorm, written to the resident output block
        o_ref[...] = layer_norm(y, plng_ref[...], plnb_ref[...])


# ------------------------------ wrapper -------------------------------------
def _patchify(pixel_values):
    """(B, C, H, W) -> (B*num_patches, C*P*P), feature order (c, ph, pw) matching
    a Conv2d weight of shape (D, C, P, P) flattened (stride == kernel, 'valid')."""
    B, C, Hh, Ww = pixel_values.shape
    nh, nw = Hh // PATCH, Ww // PATCH
    p = pixel_values.reshape(B, C, nh, PATCH, nw, PATCH)
    p = p.transpose(0, 2, 4, 1, 3, 5)
    return p.reshape(B * nh * nw, C * PATCH * PATCH)


def _const_spec(shape):
    nd = len(shape)
    return pl.BlockSpec(shape, lambda l, _nd=nd: (0,) * _nd)


def _layer_spec(shape_tail):
    nd = 1 + len(shape_tail)
    return pl.BlockSpec((1,) + tuple(shape_tail),
                        lambda l, _nd=nd: (l,) + (0,) * (_nd - 1))


@jax.jit
def siglip_vision_forward(pixel_values, p):
    """Full SiglipVisionModel forward: embeddings -> encoder -> post-LN. Returns (B,S,D)."""
    B = pixel_values.shape[0]
    D, I, S = HIDDEN, INTERMEDIATE, SEQ
    N = B * S
    F = CHANNELS * PATCH * PATCH
    patches = _patchify(pixel_values)                        # (N, F)  layout-only, fused by XLA

    kernel = functools.partial(
        _siglip_kernel, batch=B, seq=S, heads=NUM_HEADS, head_dim=HEAD_DIM,
        hidden=D, scale=SCALE, eps=LN_EPS)

    in_specs = [
        _const_spec((N, F)),                                  # patches
        _const_spec((F, D)),                                  # patch-embedding weight
        _const_spec((1, D)),                                  # patch-embedding bias
        _const_spec((S, D)),                                  # positional embedding
        _layer_spec((1, D)), _layer_spec((1, D)),             # ln1 gamma / beta
        _layer_spec((D, 3 * D)), _layer_spec((1, 3 * D)),     # fused Wqkv / bqkv
        _layer_spec((NUM_HEADS, HEAD_DIM, D)),                # Wo, head-major
        _layer_spec((1, D)),                                  # bo
        _layer_spec((1, D)), _layer_spec((1, D)),             # ln2 gamma / beta
        _layer_spec((D, I)), _layer_spec((1, I)),             # fc1
        _layer_spec((I, D)), _layer_spec((1, D)),             # fc2
        _const_spec((1, D)), _const_spec((1, D)),             # post-LN gamma / beta
    ]

    out2d = pl.pallas_call(
        kernel,
        out_shape=jax.ShapeDtypeStruct((N, D), jnp.float32),
        grid_spec=pltpu.PrefetchScalarGridSpec(
            num_scalar_prefetch=0,
            grid=(NUM_LAYERS,),
            in_specs=in_specs,
            out_specs=_const_spec((N, D)),
            scratch_shapes=[pltpu.VMEM((N, D), jnp.float32)],   # resident hidden-state carry
        ),
        compiler_params=pltpu.CompilerParams(
            dimension_semantics=("arbitrary",)),
    )(
        patches, p["wp"], p["bp"], p["pos"],
        p["ln1_g"], p["ln1_b"], p["wqkv"], p["bqkv"], p["woh"], p["bo"],
        p["ln2_g"], p["ln2_b"], p["w1"], p["b1"], p["w2"], p["b2"],
        p["postln_g"], p["postln_b"],
    )
    return out2d.reshape(B, S, D)
    # TODO(synk): on v7x add a 2-wide "parallel" batch grid axis (or core_map over 2 TCs)
    # so both TensorCores are used; at these toy shapes the single fused call is faster.


# ------------------------------ param init ---------------------------------
def init_params(key):
    D, I, L = HIDDEN, INTERMEDIATE, NUM_LAYERS
    F = CHANNELS * PATCH * PATCH
    keys = iter(jax.random.split(key, 5 + 16 * L))

    def nrm(shape, scale):
        return scale * jax.random.normal(next(keys), shape, jnp.float32)

    params = {
        "wp": nrm((F, D), 0.05).astype(jnp.bfloat16),
        "bp": nrm((1, D), 0.02),
        "pos": nrm((SEQ, D), 1.0),               # nn.Embedding-like N(0,1)
        "postln_g": 1.0 + nrm((1, D), 0.05),
        "postln_b": nrm((1, D), 0.05),
    }
    stacks = {k: [] for k in ("wqkv", "bqkv", "woh", "bo", "ln1_g", "ln1_b",
                              "ln2_g", "ln2_b", "w1", "b1", "w2", "b2")}
    for _ in range(L):
        wq, wk, wv = nrm((D, D), 0.02), nrm((D, D), 0.02), nrm((D, D), 0.02)
        bq, bk, bv = nrm((1, D), 0.02), nrm((1, D), 0.02), nrm((1, D), 0.02)
        wo = nrm((D, D), 0.02)
        stacks["wqkv"].append(jnp.concatenate([wq, wk, wv], axis=1).astype(jnp.bfloat16))
        stacks["bqkv"].append(jnp.concatenate([bq, bk, bv], axis=1))
        stacks["woh"].append(wo.reshape(NUM_HEADS, HEAD_DIM, D).astype(jnp.bfloat16))
        stacks["bo"].append(nrm((1, D), 0.02))
        stacks["ln1_g"].append(1.0 + nrm((1, D), 0.05))
        stacks["ln1_b"].append(nrm((1, D), 0.05))
        stacks["ln2_g"].append(1.0 + nrm((1, D), 0.05))
        stacks["ln2_b"].append(nrm((1, D), 0.05))
        stacks["w1"].append(nrm((D, I), 0.02).astype(jnp.bfloat16))
        stacks["b1"].append(nrm((1, I), 0.02))
        stacks["w2"].append(nrm((I, D), 0.05).astype(jnp.bfloat16))
        stacks["b2"].append(nrm((1, D), 0.02))
    params.update({k: jnp.stack(v) for k, v in stacks.items()})
    return params


# --------------------------- pure-JAX reference -----------------------------
def _reference_forward(pixel_values, p):
    B = pixel_values.shape[0]
    D, S, H, hd = HIDDEN, SEQ, NUM_HEADS, HEAD_DIM

    def ln(v, g, b):
        mu = jnp.mean(v, -1, keepdims=True)
        var = jnp.mean((v - mu) ** 2, -1, keepdims=True)
        return (v - mu) / jnp.sqrt(var + LN_EPS) * g + b

    patches = _patchify(pixel_values).reshape(B, S, -1)
    x = patches @ p["wp"].astype(jnp.float32) + p["bp"][0] + p["pos"][None]
    for l in range(NUM_LAYERS):
        wqkv = p["wqkv"][l].astype(jnp.float32)
        wo = p["woh"][l].astype(jnp.float32).reshape(D, D)
        h = ln(x, p["ln1_g"][l][0], p["ln1_b"][l][0])
        qkv = h @ wqkv + p["bqkv"][l][0]
        q, k, v = qkv[..., :D], qkv[..., D:2 * D], qkv[..., 2 * D:]
        q = q.reshape(B, S, H, hd).transpose(0, 2, 1, 3)
        k = k.reshape(B, S, H, hd).transpose(0, 2, 1, 3)
        v = v.reshape(B, S, H, hd).transpose(0, 2, 1, 3)
        s = jnp.einsum("bhqd,bhkd->bhqk", q, k) * SCALE
        w = jax.nn.softmax(s, axis=-1)
        o = jnp.einsum("bhqk,bhkd->bhqd", w, v).transpose(0, 2, 1, 3).reshape(B, S, D)
        x = x + (o @ wo + p["bo"][l][0])
        h2 = ln(x, p["ln2_g"][l][0], p["ln2_b"][l][0])
        f = h2 @ p["w1"][l].astype(jnp.float32) + p["b1"][l][0]
        f = jax.nn.gelu(f, approximate=True)
        x = x + (f @ p["w2"][l].astype(jnp.float32) + p["b2"][l][0])
    return ln(x, p["postln_g"][0], p["postln_b"][0])


# --------------------------------- main -------------------------------------
if __name__ == "__main__":
    key = jax.random.PRNGKey(0)
    k_pix, k_par = jax.random.split(key)

    pixel_values = jax.random.normal(k_pix, (BATCH, CHANNELS, IMAGE, IMAGE), jnp.float32)
    params = init_params(k_par)

    out = siglip_vision_forward(pixel_values, params)
    out = jax.block_until_ready(out)

    ref = _reference_forward(pixel_values, params)
    assert out.shape == (BATCH, SEQ, HIDDEN)
    max_err = float(jnp.max(jnp.abs(out - ref)))
    # bf16 matmul operands + approx reciprocal -> tolerance loosened accordingly
    assert max_err < 2e-2, max_err

    print("KERNEL_OK")
</pallas_src>

<mosaic_0001>
module attributes {stable_mosaic.version = 11 : i64} {
  func.func @_siglip_kernel(%arg0: i32, %arg1: memref<32x192xf32, #tpu.memory_space<vmem>>, %arg2: memref<192x128xbf16, #tpu.memory_space<vmem>>, %arg3: memref<1x128xf32, #tpu.memory_space<vmem>>, %arg4: memref<16x128xf32, #tpu.memory_space<vmem>>, %arg5: memref<1x1x128xf32, #tpu.memory_space<vmem>>, %arg6: memref<1x1x128xf32, #tpu.memory_space<vmem>>, %arg7: memref<1x128x384xbf16, #tpu.memory_space<vmem>>, %arg8: memref<1x1x384xf32, #tpu.memory_space<vmem>>, %arg9: memref<1x4x32x128xbf16, #tpu.memory_space<vmem>>, %arg10: memref<1x1x128xf32, #tpu.memory_space<vmem>>, %arg11: memref<1x1x128xf32, #tpu.memory_space<vmem>>, %arg12: memref<1x1x128xf32, #tpu.memory_space<vmem>>, %arg13: memref<1x128x256xbf16, #tpu.memory_space<vmem>>, %arg14: memref<1x1x256xf32, #tpu.memory_space<vmem>>, %arg15: memref<1x256x128xbf16, #tpu.memory_space<vmem>>, %arg16: memref<1x1x128xf32, #tpu.memory_space<vmem>>, %arg17: memref<1x128xf32, #tpu.memory_space<vmem>>, %arg18: memref<1x128xf32, #tpu.memory_space<vmem>>, %arg19: memref<32x128xf32, #tpu.memory_space<vmem>>, %arg20: memref<32x128xf32, #tpu.memory_space<vmem>>) attributes {dimension_semantics = [#tpu.dimension_semantics<arbitrary>], iteration_bounds = array<i64: 2>, scalar_prefetch = 0 : i64, scratch_operands = 1 : i64, tpu.core_type = #tpu.core_type<tc>, window_params = [{pipeline_mode = #tpu.pipeline_mode<synchronous>, transform_indices = @transform_0, window_bounds = array<i64: 32, 192>}, {pipeline_mode = #tpu.pipeline_mode<synchronous>, transform_indices = @transform_1, window_bounds = array<i64: 192, 128>}, {pipeline_mode = #tpu.pipeline_mode<synchronous>, transform_indices = @transform_2, window_bounds = array<i64: 1, 128>}, {pipeline_mode = #tpu.pipeline_mode<synchronous>, transform_indices = @transform_3, window_bounds = array<i64: 16, 128>}, {transform_indices = @transform_4, window_bounds = array<i64: 1, 1, 128>}, {transform_indices = @transform_5, window_bounds = array<i64: 1, 1, 128>}, {transform_indices = @transform_6, window_bounds = array<i64: 1, 128, 384>}, {transform_indices = @transform_7, window_bounds = array<i64: 1, 1, 384>}, {transform_indices = @transform_8, window_bounds = array<i64: 1, 4, 32, 128>}, {transform_indices = @transform_9, window_bounds = array<i64: 1, 1, 128>}, {transform_indices = @transform_10, window_bounds = array<i64: 1, 1, 128>}, {transform_indices = @transform_11, window_bounds = array<i64: 1, 1, 128>}, {transform_indices = @transform_12, window_bounds = array<i64: 1, 128, 256>}, {transform_indices = @transform_13, window_bounds = array<i64: 1, 1, 256>}, {transform_indices = @transform_14, window_bounds = array<i64: 1, 256, 128>}, {transform_indices = @transform_15, window_bounds = array<i64: 1, 1, 128>}, {pipeline_mode = #tpu.pipeline_mode<synchronous>, transform_indices = @transform_16, window_bounds = array<i64: 1, 128>}, {pipeline_mode = #tpu.pipeline_mode<synchronous>, transform_indices = @transform_17, window_bounds = array<i64: 1, 128>}, {pipeline_mode = #tpu.pipeline_mode<synchronous>, transform_indices = @transform_18, window_bounds = array<i64: 32, 128>}]} {
    %c0_i32 = arith.constant 0 : i32
    %0 = arith.cmpi eq, %arg0, %c0_i32 : i32
    %1 = arith.extui %0 : i1 to i32
    %c0_i32_0 = arith.constant 0 : i32
    %2 = arith.cmpi ne, %1, %c0_i32_0 : i32
    scf.if %2 {
      %c0_72 = arith.constant 0 : index
      %c0_73 = arith.constant 0 : index
      %207 = vector.load %arg1[%c0_72, %c0_73] : memref<32x192xf32, #tpu.memory_space<vmem>>, vector<32x192xf32>
      %208 = arith.truncf %207 : vector<32x192xf32> to vector<32x192xbf16>
      %c0_74 = arith.constant 0 : index
      %c0_75 = arith.constant 0 : index
      %209 = vector.load %arg2[%c0_74, %c0_75] : memref<192x128xbf16, #tpu.memory_space<vmem>>, vector<192x128xbf16>
      %cst_76 = arith.constant dense<0.000000e+00> : vector<32x128xf32>
      %210 = tpu.matmul %208, %209, %cst_76 {dimension_numbers = #tpu.dot_dimension_numbers<[1], [0], [0], [1], [0, 0, 1, 1], [], []>} : vector<32x192xbf16>, vector<192x128xbf16>, vector<32x128xf32> -> vector<32x128xf32>
      %c0_77 = arith.constant 0 : index
      %c0_78 = arith.constant 0 : index
      %211 = vector.load %arg3[%c0_77, %c0_78] : memref<1x128xf32, #tpu.memory_space<vmem>>, vector<1x128xf32>
      %212 = vector.broadcast %211 : vector<1x128xf32> to vector<32x128xf32>
      %213 = arith.addf %210, %212 : vector<32x128xf32>
      %c0_79 = arith.constant 0 : index
      %c0_80 = arith.constant 0 : index
      %214 = vector.load %arg4[%c0_79, %c0_80] : memref<16x128xf32, #tpu.memory_space<vmem>>, vector<16x128xf32>
      %215 = tpu.concatenate %214, %214 in 0 : vector<16x128xf32>, vector<16x128xf32> -> vector<32x128xf32>
      %216 = arith.addf %213, %215 : vector<32x128xf32>
      %c0_81 = arith.constant 0 : index
      %c0_82 = arith.constant 0 : index
      %217 = vector.load %arg20[%c0_81, %c0_82] : memref<32x128xf32, #tpu.memory_space<vmem>>, vector<32x128xf32>
      tpu.vector_store %arg20[%c0_81, %c0_82], %216 {strides = array<i32>} : memref<32x128xf32, #tpu.memory_space<vmem>>, vector<32x128xf32>,
    } else {
    }
    %c0 = arith.constant 0 : index
    %c0_1 = arith.constant 0 : index
    %3 = vector.load %arg20[%c0, %c0_1] : memref<32x128xf32, #tpu.memory_space<vmem>>, vector<32x128xf32>
    %c0_2 = arith.constant 0 : index
    %c0_3 = arith.constant 0 : index
    %c0_4 = arith.constant 0 : index
    %4 = vector.load %arg5[%c0_2, %c0_3, %c0_4] : memref<1x1x128xf32, #tpu.memory_space<vmem>>, vector<1x1x128xf32>
    %5 = vector.shape_cast %4 : vector<1x1x128xf32> to vector<1x128xf32>
    %c0_5 = arith.constant 0 : index
    %c0_6 = arith.constant 0 : index
    %c0_7 = arith.constant 0 : index
    %6 = vector.load %arg6[%c0_5, %c0_6, %c0_7] : memref<1x1x128xf32, #tpu.memory_space<vmem>>, vector<1x1x128xf32>
    %7 = vector.shape_cast %6 : vector<1x1x128xf32> to vector<1x128xf32>
    %cst = arith.constant dense<0.000000e+00> : vector<32xf32>
    %8 = vector.multi_reduction <add>, %3, %cst [1] : vector<32x128xf32> to vector<32xf32>
    %9 = vector.shape_cast %8 : vector<32xf32> to vector<32x1xf32>
    %cst_8 = arith.constant 1.280000e+02 : f32
    %10 = vector.broadcast %cst_8 : f32 to vector<32x1xf32>
    %11 = arith.divf %9, %10 : vector<32x1xf32>
    %12 = vector.broadcast %11 : vector<32x1xf32> to vector<32x128xf32>
    %13 = arith.subf %3, %12 : vector<32x128xf32>
    %14 = arith.mulf %13, %13 : vector<32x128xf32>
    %cst_9 = arith.constant dense<0.000000e+00> : vector<32xf32>
    %15 = vector.multi_reduction <add>, %14, %cst_9 [1] : vector<32x128xf32> to vector<32xf32>
    %16 = vector.shape_cast %15 : vector<32xf32> to vector<32x1xf32>
    %cst_10 = arith.constant 1.280000e+02 : f32
    %17 = vector.broadcast %cst_10 : f32 to vector<32x1xf32>
    %18 = arith.divf %16, %17 : vector<32x1xf32>
    %19 = vector.broadcast %11 : vector<32x1xf32> to vector<32x128xf32>
    %20 = arith.subf %3, %19 : vector<32x128xf32>
    %cst_11 = arith.constant 9.99999997E-7 : f32
    %21 = vector.broadcast %cst_11 : f32 to vector<32x1xf32>
    %22 = arith.addf %18, %21 : vector<32x1xf32>
    %23 = math.rsqrt %22 : vector<32x1xf32>
    %24 = vector.broadcast %23 : vector<32x1xf32> to vector<32x128xf32>
    %25 = arith.mulf %20, %24 : vector<32x128xf32>
    %26 = vector.broadcast %5 : vector<1x128xf32> to vector<32x128xf32>
    %27 = arith.mulf %25, %26 : vector<32x128xf32>
    %28 = vector.broadcast %7 : vector<1x128xf32> to vector<32x128xf32>
    %29 = arith.addf %27, %28 : vector<32x128xf32>
    %30 = arith.truncf %29 : vector<32x128xf32> to vector<32x128xbf16>
    %c0_12 = arith.constant 0 : index
    %c0_13 = arith.constant 0 : index
    %c0_14 = arith.constant 0 : index
    %31 = vector.load %arg7[%c0_12, %c0_13, %c0_14] : memref<1x128x384xbf16, #tpu.memory_space<vmem>>, vector<1x128x384xbf16>
    %32 = vector.shape_cast %31 : vector<1x128x384xbf16> to vector<128x384xbf16>
    %cst_15 = arith.constant dense<0.000000e+00> : vector<32x384xf32>
    %33 = tpu.matmul %30, %32, %cst_15 {dimension_numbers = #tpu.dot_dimension_numbers<[1], [0], [0], [1], [0, 0, 1, 1], [], []>} : vector<32x128xbf16>, vector<128x384xbf16>, vector<32x384xf32> -> vector<32x384xf32>
    %c0_16 = arith.constant 0 : index
    %c0_17 = arith.constant 0 : index
    %c0_18 = arith.constant 0 : index
    %34 = vector.load %arg8[%c0_16, %c0_17, %c0_18] : memref<1x1x384xf32, #tpu.memory_space<vmem>>, vector<1x1x384xf32>
    %35 = vector.shape_cast %34 : vector<1x1x384xf32> to vector<1x384xf32>
    %36 = vector.broadcast %35 : vector<1x384xf32> to vector<32x384xf32>
    %37 = arith.addf %33, %36 : vector<32x384xf32>
    %38 = vector.extract_strided_slice %37 {offsets = [0, 0], sizes = [32, 128], strides = [1, 1]} : vector<32x384xf32> to vector<32x128xf32>
    %39 = vector.extract_strided_slice %37 {offsets = [0, 128], sizes = [32, 128], strides = [1, 1]} : vector<32x384xf32> to vector<32x128xf32>
    %40 = vector.extract_strided_slice %37 {offsets = [0, 256], sizes = [32, 128], strides = [1, 1]} : vector<32x384xf32> to vector<32x128xf32>
    %c0_19 = arith.constant 0 : index
    %c0_20 = arith.constant 0 : index
    %c0_21 = arith.constant 0 : index
    %c0_22 = arith.constant 0 : index
    %41 = vector.load %arg9[%c0_19, %c0_20, %c0_21, %c0_22] : memref<1x4x32x128xbf16, #tpu.memory_space<vmem>>, vector<1x4x32x128xbf16>
    %42 = vector.shape_cast %41 : vector<1x4x32x128xbf16> to vector<4x32x128xbf16>
    %43 = vector.extract_strided_slice %38 {offsets = [0, 0], sizes = [16, 32], strides = [1, 1]} : vector<32x128xf32> to vector<16x32xf32>
    %44 = vector.extract_strided_slice %38 {offsets = [0, 32], sizes = [16, 32], strides = [1, 1]} : vector<32x128xf32> to vector<16x32xf32>
    %45 = vector.extract_strided_slice %38 {offsets = [0, 64], sizes = [16, 32], strides = [1, 1]} : vector<32x128xf32> to vector<16x32xf32>
    %46 = vector.extract_strided_slice %38 {offsets = [0, 96], sizes = [16, 32], strides = [1, 1]} : vector<32x128xf32> to vector<16x32xf32>
    %47 = vector.shape_cast %43 : vector<16x32xf32> to vector<1x16x32xf32>
    %48 = vector.shape_cast %44 : vector<16x32xf32> to vector<1x16x32xf32>
    %49 = vector.shape_cast %45 : vector<16x32xf32> to vector<1x16x32xf32>
    %50 = vector.shape_cast %46 : vector<16x32xf32> to vector<1x16x32xf32>
    %51 = tpu.concatenate %47, %48, %49, %50 in 0 : vector<1x16x32xf32>, vector<1x16x32xf32>, vector<1x16x32xf32>, vector<1x16x32xf32> -> vector<4x16x32xf32>
    %52 = arith.truncf %51 : vector<4x16x32xf32> to vector<4x16x32xbf16>
    %53 = vector.extract_strided_slice %39 {offsets = [0, 0], sizes = [16, 32], strides = [1, 1]} : vector<32x128xf32> to vector<16x32xf32>
    %54 = vector.extract_strided_slice %39 {offsets = [0, 32], sizes = [16, 32], strides = [1, 1]} : vector<32x128xf32> to vector<16x32xf32>
    %55 = vector.extract_strided_slice %39 {offsets = [0, 64], sizes = [16, 32], strides = [1, 1]} : vector<32x128xf32> to vector<16x32xf32>
    %56 = vector.extract_strided_slice %39 {offsets = [0, 96], sizes = [16, 32], strides = [1, 1]} : vector<32x128xf32> to vector<16x32xf32>
    %57 = vector.shape_cast %53 : vector<16x32xf32> to vector<1x16x32xf32>
    %58 = vector.shape_cast %54 : vector<16x32xf32> to vector<1x16x32xf32>
    %59 = vector.shape_cast %55 : vector<16x32xf32> to vector<1x16x32xf32>
    %60 = vector.shape_cast %56 : vector<16x32xf32> to vector<1x16x32xf32>
    %61 = tpu.concatenate %57, %58, %59, %60 in 0 : vector<1x16x32xf32>, vector<1x16x32xf32>, vector<1x16x32xf32>, vector<1x16x32xf32> -> vector<4x16x32xf32>
    %62 = arith.truncf %61 : vector<4x16x32xf32> to vector<4x16x32xbf16>
    %63 = vector.extract_strided_slice %40 {offsets = [0, 0], sizes = [16, 32], strides = [1, 1]} : vector<32x128xf32> to vector<16x32xf32>
    %64 = vector.extract_strided_slice %40 {offsets = [0, 32], sizes = [16, 32], strides = [1, 1]} : vector<32x128xf32> to vector<16x32xf32>
    %65 = vector.extract_strided_slice %40 {offsets = [0, 64], sizes = [16, 32], strides = [1, 1]} : vector<32x128xf32> to vector<16x32xf32>
    %66 = vector.extract_strided_slice %40 {offsets = [0, 96], sizes = [16, 32], strides = [1, 1]} : vector<32x128xf32> to vector<16x32xf32>
    %67 = vector.shape_cast %63 : vector<16x32xf32> to vector<1x16x32xf32>
    %68 = vector.shape_cast %64 : vector<16x32xf32> to vector<1x16x32xf32>
    %69 = vector.shape_cast %65 : vector<16x32xf32> to vector<1x16x32xf32>
    %70 = vector.shape_cast %66 : vector<16x32xf32> to vector<1x16x32xf32>
    %71 = tpu.concatenate %67, %68, %69, %70 in 0 : vector<1x16x32xf32>, vector<1x16x32xf32>, vector<1x16x32xf32>, vector<1x16x32xf32> -> vector<4x16x32xf32>
    %72 = arith.truncf %71 : vector<4x16x32xf32> to vector<4x16x32xbf16>
    "tpu.trace_start"() <{level = 10 : i32, message = "hqd,hkd->hqk"}> : () -> ()
    %cst_23 = arith.constant dense<0.000000e+00> : vector<4x16x16xf32>
    %73 = tpu.matmul %52, %62, %cst_23 {dimension_numbers = #tpu.dot_dimension_numbers<[2], [2], [1], [1], [0, 0, 0, 1, 1, 1], [0], [0]>} : vector<4x16x32xbf16>, vector<4x16x32xbf16>, vector<4x16x16xf32> -> vector<4x16x16xf32>
    "tpu.trace_stop"() : () -> ()
    %cst_24 = arith.constant 0.176776692 : f32
    %74 = vector.broadcast %cst_24 : f32 to vector<4x16x16xf32>
    %75 = arith.mulf %73, %74 : vector<4x16x16xf32>
    %cst_25 = arith.constant dense<0xFF800000> : vector<4x16xf32>
    %76 = vector.multi_reduction <maximumf>, %75, %cst_25 [2] : vector<4x16x16xf32> to vector<4x16xf32>
    %77 = vector.shape_cast %76 : vector<4x16xf32> to vector<4x16x1xf32>
    %78 = vector.broadcast %77 : vector<4x16x1xf32> to vector<4x16x16xf32>
    %79 = arith.subf %75, %78 : vector<4x16x16xf32>
    %80 = math.exp %79 : vector<4x16x16xf32>
    %cst_26 = arith.constant dense<0.000000e+00> : vector<4x16xf32>
    %81 = vector.multi_reduction <add>, %80, %cst_26 [2] : vector<4x16x16xf32> to vector<4x16xf32>
    %82 = vector.shape_cast %81 : vector<4x16xf32> to vector<4x16x1xf32>
    %83 = tpu.reciprocal %82 {approx = true} : vector<4x16x1xf32> -> vector<4x16x1xf32>
    %84 = vector.broadcast %83 : vector<4x16x1xf32> to vector<4x16x16xf32>
    %85 = arith.mulf %80, %84 : vector<4x16x16xf32>
    %86 = arith.truncf %85 : vector<4x16x16xf32> to vector<4x16x16xbf16>
    "tpu.trace_start"() <{level = 10 : i32, message = "hqk,hkd->hqd"}> : () -> ()
    %cst_27 = arith.constant dense<0.000000e+00> : vector<4x16x32xf32>
    %87 = tpu.matmul %86, %72, %cst_27 {dimension_numbers = #tpu.dot_dimension_numbers<[2], [1], [1], [2], [0, 0, 0, 1, 1, 2], [0], [0]>} : vector<4x16x16xbf16>, vector<4x16x32xbf16>, vector<4x16x32xf32> -> vector<4x16x32xf32>
    "tpu.trace_stop"() : () -> ()
    %88 = arith.truncf %87 : vector<4x16x32xf32> to vector<4x16x32xbf16>
    "tpu.trace_start"() <{level = 10 : i32, message = "hqd,hdf->hqf"}> : () -> ()
    %cst_28 = arith.constant dense<0.000000e+00> : vector<4x16x128xf32>
    %89 = tpu.matmul %88, %42, %cst_28 {dimension_numbers = #tpu.dot_dimension_numbers<[2], [1], [1], [2], [0, 0, 0, 1, 1, 2], [0], [0]>} : vector<4x16x32xbf16>, vector<4x32x128xbf16>, vector<4x16x128xf32> -> vector<4x16x128xf32>
    "tpu.trace_stop"() : () -> ()
    %cst_29 = arith.constant dense<0.000000e+00> : vector<16x128xf32>
    %90 = vector.multi_reduction <add>, %89, %cst_29 [0] : vector<4x16x128xf32> to vector<16x128xf32>
    %91 = vector.extract_strided_slice %38 {offsets = [16, 0], sizes = [16, 32], strides = [1, 1]} : vector<32x128xf32> to vector<16x32xf32>
    %92 = vector.extract_strided_slice %38 {offsets = [16, 32], sizes = [16, 32], strides = [1, 1]} : vector<32x128xf32> to vector<16x32xf32>
    %93 = vector.extract_strided_slice %38 {offsets = [16, 64], sizes = [16, 32], strides = [1, 1]} : vector<32x128xf32> to vector<16x32xf32>
    %94 = vector.extract_strided_slice %38 {offsets = [16, 96], sizes = [16, 32], strides = [1, 1]} : vector<32x128xf32> to vector<16x32xf32>
    %95 = vector.shape_cast %91 : vector<16x32xf32> to vector<1x16x32xf32>
    %96 = vector.shape_cast %92 : vector<16x32xf32> to vector<1x16x32xf32>
    %97 = vector.shape_cast %93 : vector<16x32xf32> to vector<1x16x32xf32>
    %98 = vector.shape_cast %94 : vector<16x32xf32> to vector<1x16x32xf32>
    %99 = tpu.concatenate %95, %96, %97, %98 in 0 : vector<1x16x32xf32>, vector<1x16x32xf32>, vector<1x16x32xf32>, vector<1x16x32xf32> -> vector<4x16x32xf32>
    %100 = arith.truncf %99 : vector<4x16x32xf32> to vector<4x16x32xbf16>
    %101 = vector.extract_strided_slice %39 {offsets = [16, 0], sizes = [16, 32], strides = [1, 1]} : vector<32x128xf32> to vector<16x32xf32>
    %102 = vector.extract_strided_slice %39 {offsets = [16, 32], sizes = [16, 32], strides = [1, 1]} : vector<32x128xf32> to vector<16x32xf32>
    %103 = vector.extract_strided_slice %39 {offsets = [16, 64], sizes = [16, 32], strides = [1, 1]} : vector<32x128xf32> to vector<16x32xf32>
    %104 = vector.extract_strided_slice %39 {offsets = [16, 96], sizes = [16, 32], strides = [1, 1]} : vector<32x128xf32> to vector<16x32xf32>
    %105 = vector.shape_cast %101 : vector<16x32xf32> to vector<1x16x32xf32>
    %106 = vector.shape_cast %102 : vector<16x32xf32> to vector<1x16x32xf32>
    %107 = vector.shape_cast %103 : vector<16x32xf32> to vector<1x16x32xf32>
    %108 = vector.shape_cast %104 : vector<16x32xf32> to vector<1x16x32xf32>
    %109 = tpu.concatenate %105, %106, %107, %108 in 0 : vector<1x16x32xf32>, vector<1x16x32xf32>, vector<1x16x32xf32>, vector<1x16x32xf32> -> vector<4x16x32xf32>
    %110 = arith.truncf %109 : vector<4x16x32xf32> to vector<4x16x32xbf16>
    %111 = vector.extract_strided_slice %40 {offsets = [16, 0], sizes = [16, 32], strides = [1, 1]} : vector<32x128xf32> to vector<16x32xf32>
    %112 = vector.extract_strided_slice %40 {offsets = [16, 32], sizes = [16, 32], strides = [1, 1]} : vector<32x128xf32> to vector<16x32xf32>
    %113 = vector.extract_strided_slice %40 {offsets = [16, 64], sizes = [16, 32], strides = [1, 1]} : vector<32x128xf32> to vector<16x32xf32>
    %114 = vector.extract_strided_slice %40 {offsets = [16, 96], sizes = [16, 32], strides = [1, 1]} : vector<32x128xf32> to vector<16x32xf32>
    %115 = vector.shape_cast %111 : vector<16x32xf32> to vector<1x16x32xf32>
    %116 = vector.shape_cast %112 : vector<16x32xf32> to vector<1x16x32xf32>
    %117 = vector.shape_cast %113 : vector<16x32xf32> to vector<1x16x32xf32>
    %118 = vector.shape_cast %114 : vector<16x32xf32> to vector<1x16x32xf32>
    %119 = tpu.concatenate %115, %116, %117, %118 in 0 : vector<1x16x32xf32>, vector<1x16x32xf32>, vector<1x16x32xf32>, vector<1x16x32xf32> -> vector<4x16x32xf32>
    %120 = arith.truncf %119 : vector<4x16x32xf32> to vector<4x16x32xbf16>
    "tpu.trace_start"() <{level = 10 : i32, message = "hqd,hkd->hqk"}> : () -> ()
    %cst_30 = arith.constant dense<0.000000e+00> : vector<4x16x16xf32>
    %121 = tpu.matmul %100, %110, %cst_30 {dimension_numbers = #tpu.dot_dimension_numbers<[2], [2], [1], [1], [0, 0, 0, 1, 1, 1], [0], [0]>} : vector<4x16x32xbf16>, vector<4x16x32xbf16>, vector<4x16x16xf32> -> vector<4x16x16xf32>
    "tpu.trace_stop"() : () -> ()
    %cst_31 = arith.constant 0.176776692 : f32
    %122 = vector.broadcast %cst_31 : f32 to vector<4x16x16xf32>
    %123 = arith.mulf %121, %122 : vector<4x16x16xf32>
    %cst_32 = arith.constant dense<0xFF800000> : vector<4x16xf32>
    %124 = vector.multi_reduction <maximumf>, %123, %cst_32 [2] : vector<4x16x16xf32> to vector<4x16xf32>
    %125 = vector.shape_cast %124 : vector<4x16xf32> to vector<4x16x1xf32>
    %126 = vector.broadcast %125 : vector<4x16x1xf32> to vector<4x16x16xf32>
    %127 = arith.subf %123, %126 : vector<4x16x16xf32>
    %128 = math.exp %127 : vector<4x16x16xf32>
    %cst_33 = arith.constant dense<0.000000e+00> : vector<4x16xf32>
    %129 = vector.multi_reduction <add>, %128, %cst_33 [2] : vector<4x16x16xf32> to vector<4x16xf32>
    %130 = vector.shape_cast %129 : vector<4x16xf32> to vector<4x16x1xf32>
    %131 = tpu.reciprocal %130 {approx = true} : vector<4x16x1xf32> -> vector<4x16x1xf32>
    %132 = vector.broadcast %131 : vector<4x16x1xf32> to vector<4x16x16xf32>
    %133 = arith.mulf %128, %132 : vector<4x16x16xf32>
    %134 = arith.truncf %133 : vector<4x16x16xf32> to vector<4x16x16xbf16>
    "tpu.trace_start"() <{level = 10 : i32, message = "hqk,hkd->hqd"}> : () -> ()
    %cst_34 = arith.constant dense<0.000000e+00> : vector<4x16x32xf32>
    %135 = tpu.matmul %134, %120, %cst_34 {dimension_numbers = #tpu.dot_dimension_numbers<[2], [1], [1], [2], [0, 0, 0, 1, 1, 2], [0], [0]>} : vector<4x16x16xbf16>, vector<4x16x32xbf16>, vector<4x16x32xf32> -> vector<4x16x32xf32>
    "tpu.trace_stop"() : () -> ()
    %136 = arith.truncf %135 : vector<4x16x32xf32> to vector<4x16x32xbf16>
    "tpu.trace_start"() <{level = 10 : i32, message = "hqd,hdf->hqf"}> : () -> ()
    %cst_35 = arith.constant dense<0.000000e+00> : vector<4x16x128xf32>
    %137 = tpu.matmul %136, %42, %cst_35 {dimension_numbers = #tpu.dot_dimension_numbers<[2], [1], [1], [2], [0, 0, 0, 1, 1, 2], [0], [0]>} : vector<4x16x32xbf16>, vector<4x32x128xbf16>, vector<4x16x128xf32> -> vector<4x16x128xf32>
    "tpu.trace_stop"() : () -> ()
    %cst_36 = arith.constant dense<0.000000e+00> : vector<16x128xf32>
    %138 = vector.multi_reduction <add>, %137, %cst_36 [0] : vector<4x16x128xf32> to vector<16x128xf32>
    %139 = tpu.concatenate %90, %138 in 0 : vector<16x128xf32>, vector<16x128xf32> -> vector<32x128xf32>
    %c0_37 = arith.constant 0 : index
    %c0_38 = arith.constant 0 : index
    %c0_39 = arith.constant 0 : index
    %140 = vector.load %arg10[%c0_37, %c0_38, %c0_39] : memref<1x1x128xf32, #tpu.memory_space<vmem>>, vector<1x1x128xf32>
    %141 = vector.shape_cast %140 : vector<1x1x128xf32> to vector<1x128xf32>
    %142 = vector.broadcast %141 : vector<1x128xf32> to vector<32x128xf32>
    %143 = arith.addf %139, %142 : vector<32x128xf32>
    %144 = arith.addf %3, %143 : vector<32x128xf32>
    %c0_40 = arith.constant 0 : index
    %c0_41 = arith.constant 0 : index
    %c0_42 = arith.constant 0 : index
    %145 = vector.load %arg11[%c0_40, %c0_41, %c0_42] : memref<1x1x128xf32, #tpu.memory_space<vmem>>, vector<1x1x128xf32>
    %146 = vector.shape_cast %145 : vector<1x1x128xf32> to vector<1x128xf32>
    %c0_43 = arith.constant 0 : index
    %c0_44 = arith.constant 0 : index
    %c0_45 = arith.constant 0 : index
    %147 = vector.load %arg12[%c0_43, %c0_44, %c0_45] : memref<1x1x128xf32, #tpu.memory_space<vmem>>, vector<1x1x128xf32>
    %148 = vector.shape_cast %147 : vector<1x1x128xf32> to vector<1x128xf32>
    %cst_46 = arith.constant dense<0.000000e+00> : vector<32xf32>
    %149 = vector.multi_reduction <add>, %144, %cst_46 [1] : vector<32x128xf32> to vector<32xf32>
    %150 = vector.shape_cast %149 : vector<32xf32> to vector<32x1xf32>
    %cst_47 = arith.constant 1.280000e+02 : f32
    %151 = vector.broadcast %cst_47 : f32 to vector<32x1xf32>
    %152 = arith.divf %150, %151 : vector<32x1xf32>
    %153 = vector.broadcast %152 : vector<32x1xf32> to vector<32x128xf32>
    %154 = arith.subf %144, %153 : vector<32x128xf32>
    %155 = arith.mulf %154, %154 : vector<32x128xf32>
    %cst_48 = arith.constant dense<0.000000e+00> : vector<32xf32>
    %156 = vector.multi_reduction <add>, %155, %cst_48 [1] : vector<32x128xf32> to vector<32xf32>
    %157 = vector.shape_cast %156 : vector<32xf32> to vector<32x1xf32>
    %cst_49 = arith.constant 1.280000e+02 : f32
    %158 = vector.broadcast %cst_49 : f32 to vector<32x1xf32>
    %159 = arith.divf %157, %158 : vector<32x1xf32>
    %160 = vector.broadcast %152 : vector<32x1xf32> to vector<32x128xf32>
    %161 = arith.subf %144, %160 : vector<32x128xf32>
    %cst_50 = arith.constant 9.99999997E-7 : f32
    %162 = vector.broadcast %cst_50 : f32 to vector<32x1xf32>
    %163 = arith.addf %159, %162 : vector<32x1xf32>
    %164 = math.rsqrt %163 : vector<32x1xf32>
    %165 = vector.broadcast %164 : vector<32x1xf32> to vector<32x128xf32>
    %166 = arith.mulf %161, %165 : vector<32x128xf32>
    %167 = vector.broadcast %146 : vector<1x128xf32> to vector<32x128xf32>
    %168 = arith.mulf %166, %167 : vector<32x128xf32>
    %169 = vector.broadcast %148 : vector<1x128xf32> to vector<32x128xf32>
    %170 = arith.addf %168, %169 : vector<32x128xf32>
    %171 = arith.truncf %170 : vector<32x128xf32> to vector<32x128xbf16>
    %c0_51 = arith.constant 0 : index
    %c0_52 = arith.constant 0 : index
    %c0_53 = arith.constant 0 : index
    %172 = vector.load %arg13[%c0_51, %c0_52, %c0_53] : memref<1x128x256xbf16, #tpu.memory_space<vmem>>, vector<1x128x256xbf16>
    %173 = vector.shape_cast %172 : vector<1x128x256xbf16> to vector<128x256xbf16>
    %cst_54 = arith.constant dense<0.000000e+00> : vector<32x256xf32>
    %174 = tpu.matmul %171, %173, %cst_54 {dimension_numbers = #tpu.dot_dimension_numbers<[1], [0], [0], [1], [0, 0, 1, 1], [], []>} : vector<32x128xbf16>, vector<128x256xbf16>, vector<32x256xf32> -> vector<32x256xf32>
    %c0_55 = arith.constant 0 : index
    %c0_56 = arith.constant 0 : index
    %c0_57 = arith.constant 0 : index
    %175 = vector.load %arg14[%c0_55, %c0_56, %c0_57] : memref<1x1x256xf32, #tpu.memory_space<vmem>>, vector<1x1x256xf32>
    %176 = vector.shape_cast %175 : vector<1x1x256xf32> to vector<1x256xf32>
    %177 = vector.broadcast %176 : vector<1x256xf32> to vector<32x256xf32>
    %178 = arith.addf %174, %177 : vector<32x256xf32>
    %cst_58 = arith.constant 5.000000e-01 : f32
    %179 = vector.broadcast %cst_58 : f32 to vector<32x256xf32>
    %180 = arith.mulf %179, %178 : vector<32x256xf32>
    %cst_59 = arith.constant 4.471500e-02 : f32
    %181 = vector.broadcast %cst_59 : f32 to vector<32x256xf32>
    %182 = arith.mulf %181, %178 : vector<32x256xf32>
    %183 = arith.mulf %182, %178 : vector<32x256xf32>
    %184 = arith.mulf %183, %178 : vector<32x256xf32>
    %185 = arith.addf %178, %184 : vector<32x256xf32>
    %cst_60 = arith.constant 0.797884583 : f32
    %186 = vector.broadcast %cst_60 : f32 to vector<32x256xf32>
    %187 = arith.mulf %186, %185 : vector<32x256xf32>
    %188 = math.tanh %187 : vector<32x256xf32>
    %cst_61 = arith.constant 1.000000e+00 : f32
    %189 = vector.broadcast %cst_61 : f32 to vector<32x256xf32>
    %190 = arith.addf %189, %188 : vector<32x256xf32>
    %191 = arith.mulf %180, %190 : vector<32x256xf32>
    %192 = arith.truncf %191 : vector<32x256xf32> to vector<32x256xbf16>
    %c0_62 = arith.constant 0 : index
    %c0_63 = arith.constant 0 : index
    %c0_64 = arith.constant 0 : index
    %193 = vector.load %arg15[%c0_62, %c0_63, %c0_64] : memref<1x256x128xbf16, #tpu.memory_space<vmem>>, vector<1x256x128xbf16>
    %194 = vector.shape_cast %193 : vector<1x256x128xbf16> to vector<256x128xbf16>
    %cst_65 = arith.constant dense<0.000000e+00> : vector<32x128xf32>
    %195 = tpu.matmul %192, %194, %cst_65 {dimension_numbers = #tpu.dot_dimension_numbers<[1], [0], [0], [1], [0, 0, 1, 1], [], []>} : vector<32x256xbf16>, vector<256x128xbf16>, vector<32x128xf32> -> vector<32x128xf32>
    %c0_66 = arith.constant 0 : index
    %c0_67 = arith.constant 0 : index
    %c0_68 = arith.constant 0 : index
    %196 = vector.load %arg16[%c0_66, %c0_67, %c0_68] : memref<1x1x128xf32, #tpu.memory_space<vmem>>, vector<1x1x128xf32>
    %197 = vector.shape_cast %196 : vector<1x1x128xf32> to vector<1x128xf32>
    %198 = vector.broadcast %197 : vector<1x128xf32> to vector<32x128xf32>
    %199 = arith.addf %195, %198 : vector<32x128xf32>
    %200 = arith.addf %144, %199 : vector<32x128xf32>
    %c1_i32 = arith.constant 1 : i32
    %201 = arith.cmpi slt, %arg0, %c1_i32 : i32
    %202 = arith.extui %201 : i1 to i32
    %c0_i32_69 = arith.constant 0 : i32
    %203 = arith.cmpi ne, %202, %c0_i32_69 : i32
    scf.if %203 {
      %c0_72 = arith.constant 0 : index
      %c0_73 = arith.constant 0 : index
      %207 = vector.load %arg20[%c0_72, %c0_73] : memref<32x128xf32, #tpu.memory_space<vmem>>, vector<32x128xf32>
      tpu.vector_store %arg20[%c0_72, %c0_73], %200 {strides = array<i32>} : memref<32x128xf32, #tpu.memory_space<vmem>>, vector<32x128xf32>,
    } else {
    }
    %c1_i32_70 = arith.constant 1 : i32
    %204 = arith.cmpi eq, %arg0, %c1_i32_70 : i32
    %205 = arith.extui %204 : i1 to i32
    %c0_i32_71 = arith.constant 0 : i32
    %206 = arith.cmpi ne, %205, %c0_i32_71 : i32
    scf.if %206 {
      %c0_72 = arith.constant 0 : index
      %c0_73 = arith.constant 0 : index
      %207 = vector.load %arg17[%c0_72, %c0_73] : memref<1x128xf32, #tpu.memory_space<vmem>>, vector<1x128xf32>
      %c0_74 = arith.constant 0 : index
      %c0_75 = arith.constant 0 : index
      %208 = vector.load %arg18[%c0_74, %c0_75] : memref<1x128xf32, #tpu.memory_space<vmem>>, vector<1x128xf32>
      %cst_76 = arith.constant dense<0.000000e+00> : vector<32xf32>
      %209 = vector.multi_reduction <add>, %200, %cst_76 [1] : vector<32x128xf32> to vector<32xf32>
      %210 = vector.shape_cast %209 : vector<32xf32> to vector<32x1xf32>
      %cst_77 = arith.constant 1.280000e+02 : f32
      %211 = vector.broadcast %cst_77 : f32 to vector<32x1xf32>
      %212 = arith.divf %210, %211 : vector<32x1xf32>
      %213 = vector.broadcast %212 : vector<32x1xf32> to vector<32x128xf32>
      %214 = arith.subf %200, %213 : vector<32x128xf32>
      %215 = arith.mulf %214, %214 : vector<32x128xf32>
      %cst_78 = arith.constant dense<0.000000e+00> : vector<32xf32>
      %216 = vector.multi_reduction <add>, %215, %cst_78 [1] : vector<32x128xf32> to vector<32xf32>
      %217 = vector.shape_cast %216 : vector<32xf32> to vector<32x1xf32>
      %cst_79 = arith.constant 1.280000e+02 : f32
      %218 = vector.broadcast %cst_79 : f32 to vector<32x1xf32>
      %219 = arith.divf %217, %218 : vector<32x1xf32>
      %220 = vector.broadcast %212 : vector<32x1xf32> to vector<32x128xf32>
      %221 = arith.subf %200, %220 : vector<32x128xf32>
      %cst_80 = arith.constant 9.99999997E-7 : f32
      %222 = vector.broadcast %cst_80 : f32 to vector<32x1xf32>
      %223 = arith.addf %219, %222 : vector<32x1xf32>
      %224 = math.rsqrt %223 : vector<32x1xf32>
      %225 = vector.broadcast %224 : vector<32x1xf32> to vector<32x128xf32>
      %226 = arith.mulf %221, %225 : vector<32x128xf32>
      %227 = vector.broadcast %207 : vector<1x128xf32> to vector<32x128xf32>
      %228 = arith.mulf %226, %227 : vector<32x128xf32>
      %229 = vector.broadcast %208 : vector<1x128xf32> to vector<32x128xf32>
      %230 = arith.addf %228, %229 : vector<32x128xf32>
      %c0_81 = arith.constant 0 : index
      %c0_82 = arith.constant 0 : index
      %231 = vector.load %arg19[%c0_81, %c0_82] : memref<32x128xf32, #tpu.memory_space<vmem>>, vector<32x128xf32>
      tpu.vector_store %arg19[%c0_81, %c0_82], %230 {strides = array<i32>} : memref<32x128xf32, #tpu.memory_space<vmem>>, vector<32x128xf32>,
    } else {
    }
    return
  }
  func.func @transform_0(%arg0: i32) -> (i32, i32) {
    %c0_i32 = arith.constant 0 : i32
    %c0_i32_0 = arith.constant 0 : i32
    %c0_i32_1 = arith.constant 0 : i32
    return %c0_i32, %c0_i32_0 : i32, i32
  }
  func.func @transform_1(%arg0: i32) -> (i32, i32) {
    %c0_i32 = arith.constant 0 : i32
    %c0_i32_0 = arith.constant 0 : i32
    %c0_i32_1 = arith.constant 0 : i32
    return %c0_i32, %c0_i32_0 : i32, i32
  }
  func.func @transform_2(%arg0: i32) -> (i32, i32) {
    %c0_i32 = arith.constant 0 : i32
    %c0_i32_0 = arith.constant 0 : i32
    %c0_i32_1 = arith.constant 0 : i32
    return %c0_i32, %c0_i32_0 : i32, i32
  }
  func.func @transform_3(%arg0: i32) -> (i32, i32) {
    %c0_i32 = arith.constant 0 : i32
    %c0_i32_0 = arith.constant 0 : i32
    %c0_i32_1 = arith.constant 0 : i32
    return %c0_i32, %c0_i32_0 : i32, i32
  }
  func.func @transform_4(%arg0: i32) -> (i32, i32, i32) {
    %c0_i32 = arith.constant 0 : i32
    %c0_i32_0 = arith.constant 0 : i32
    %c0_i32_1 = arith.constant 0 : i32
    return %arg0, %c0_i32, %c0_i32_0 : i32, i32, i32
  }
  func.func @transform_5(%arg0: i32) -> (i32, i32, i32) {
    %c0_i32 = arith.constant 0 : i32
    %c0_i32_0 = arith.constant 0 : i32
    %c0_i32_1 = arith.constant 0 : i32
    return %arg0, %c0_i32, %c0_i32_0 : i32, i32, i32
  }
  func.func @transform_6(%arg0: i32) -> (i32, i32, i32) {
    %c0_i32 = arith.constant 0 : i32
    %c0_i32_0 = arith.constant 0 : i32
    %c0_i32_1 = arith.constant 0 : i32
    return %arg0, %c0_i32, %c0_i32_0 : i32, i32, i32
  }
  func.func @transform_7(%arg0: i32) -> (i32, i32, i32) {
    %c0_i32 = arith.constant 0 : i32
    %c0_i32_0 = arith.constant 0 : i32
    %c0_i32_1 = arith.constant 0 : i32
    return %arg0, %c0_i32, %c0_i32_0 : i32, i32, i32
  }
  func.func @transform_8(%arg0: i32) -> (i32, i32, i32, i32) {
    %c0_i32 = arith.constant 0 : i32
    %c0_i32_0 = arith.constant 0 : i32
    %c0_i32_1 = arith.constant 0 : i32
    %c0_i32_2 = arith.constant 0 : i32
    return %arg0, %c0_i32, %c0_i32_0, %c0_i32_1 : i32, i32, i32, i32
  }
  func.func @transform_9(%arg0: i32) -> (i32, i32, i32) {
    %c0_i32 = arith.constant 0 : i32
    %c0_i32_0 = arith.constant 0 : i32
    %c0_i32_1 = arith.constant 0 : i32
    return %arg0, %c0_i32, %c0_i32_0 : i32, i32, i32
  }
  func.func @transform_10(%arg0: i32) -> (i32, i32, i32) {
    %c0_i32 = arith.constant 0 : i32
    %c0_i32_0 = arith.constant 0 : i32
    %c0_i32_1 = arith.constant 0 : i32
    return %arg0, %c0_i32, %c0_i32_0 : i32, i32, i32
  }
  func.func @transform_11(%arg0: i32) -> (i32, i32, i32) {
    %c0_i32 = arith.constant 0 : i32
    %c0_i32_0 = arith.constant 0 : i32
    %c0_i32_1 = arith.constant 0 : i32
    return %arg0, %c0_i32, %c0_i32_0 : i32, i32, i32
  }
  func.func @transform_12(%arg0: i32) -> (i32, i32, i32) {
    %c0_i32 = arith.constant 0 : i32
    %c0_i32_0 = arith.constant 0 : i32
    %c0_i32_1 = arith.constant 0 : i32
    return %arg0, %c0_i32, %c0_i32_0 : i32, i32, i32
  }
  func.func @transform_13(%arg0: i32) -> (i32, i32, i32) {
    %c0_i32 = arith.constant 0 : i32
    %c0_i32_0 = arith.constant 0 : i32
    %c0_i32_1 = arith.constant 0 : i32
    return %arg0, %c0_i32, %c0_i32_0 : i32, i32, i32
  }
  func.func @transform_14(%arg0: i32) -> (i32, i32, i32) {
    %c0_i32 = arith.constant 0 : i32
    %c0_i32_0 = arith.constant 0 : i32
    %c0_i32_1 = arith.constant 0 : i32
    return %arg0, %c0_i32, %c0_i32_0 : i32, i32, i32
  }
  func.func @transform_15(%arg0: i32) -> (i32, i32, i32) {
    %c0_i32 = arith.constant 0 : i32
    %c0_i32_0 = arith.constant 0 : i32
    %c0_i32_1 = arith.constant 0 : i32
    return %arg0, %c0_i32, %c0_i32_0 : i32, i32, i32
  }
  func.func @transform_16(%arg0: i32) -> (i32, i32) {
    %c0_i32 = arith.constant 0 : i32
    %c0_i32_0 = arith.constant 0 : i32
    %c0_i32_1 = arith.constant 0 : i32
    return %c0_i32, %c0_i32_0 : i32, i32
  }
  func.func @transform_17(%arg0: i32) -> (i32, i32) {
    %c0_i32 = arith.constant 0 : i32
    %c0_i32_0 = arith.constant 0 : i32
    %c0_i32_1 = arith.constant 0 : i32
    return %c0_i32, %c0_i32_0 : i32, i32
  }
  func.func @transform_18(%arg0: i32) -> (i32, i32) {
    %c0_i32 = arith.constant 0 : i32
    %c0_i32_0 = arith.constant 0 : i32
    %c0_i32_1 = arith.constant 0 : i32
    return %c0_i32, %c0_i32_0 : i32, i32
  }
}

</mosaic_0001>

<bundles_post_ra>
// kernel: siglip_vision_forward.1
= control target key start
LH: loop header
LB: loop body
LE: loop exit
PB: predicated region body
PF: predicated region fallthrough
CT: control target
= control target key end

     0   :  { %s4630_s0 = inlined_call_operand.vmem [shape: f32[32,192], index: 0, kind: input, shape index: {}]   ;;  %s4631_s1 = inlined_call_operand.vmem [shape: bf16[192,128], index: 1, kind: input, shape index: {}]   ;;  %s4632_s2 = inlined_call_operand.vmem [shape: f32[1,128], index: 2, kind: input, shape index: {}]   ;;  %s4633_s3 = inlined_call_operand.vmem [shape: f32[16,128], index: 3, kind: input, shape index: {}]   ;;  %s4634_s4 = inlined_call_operand.vmem [shape: f32[2,1,128], index: 4, kind: input, shape index: {}]   ;;  %s4635_s5 = inlined_call_operand.vmem [shape: f32[2,1,128], index: 5, kind: input, shape index: {}]   ;;  %s4636_s6 = inlined_call_operand.vmem [shape: bf16[2,128,384], index: 6, kind: input, shape index: {}]   ;;  %s4637_s7 = inlined_call_operand.vmem [shape: f32[2,1,384], index: 7, kind: input, shape index: {}]   ;;  %s4638_s8 = inlined_call_operand.vmem [shape: bf16[2,4,32,128], index: 8, kind: input, shape index: {}]   ;;  %s4639_s9 = inlined_call_operand.vmem [shape: f32[2,1,128], index: 9, kind: input, shape index: {}]   ;;  %s4640_s10 = inlined_call_operand.vmem [shape: f32[2,1,128], index: 10, kind: input, shape index: {}]   ;;  %s4641_s11 = inlined_call_operand.vmem [shape: f32[2,1,128], index: 11, kind: input, shape index: {}]   ;;  %s4642_s12 = inlined_call_operand.vmem [shape: bf16[2,128,256], index: 12, kind: input, shape index: {}]   ;;  %s4643_s13 = inlined_call_operand.vmem [shape: f32[2,1,256], index: 13, kind: input, shape index: {}]   ;;  %s4644_s14 = inlined_call_operand.vmem [shape: bf16[2,256,128], index: 14, kind: input, shape index: {}]   ;;  %s4645_s15 = inlined_call_operand.vmem [shape: f32[2,1,128], index: 15, kind: input, shape index: {}]   ;;  %s4646_s16 = inlined_call_operand.vmem [shape: f32[1,128], index: 16, kind: input, shape index: {}]   ;;  %s4647_s17 = inlined_call_operand.vmem [shape: f32[1,128], index: 17, kind: input, shape index: {}]   ;;  %s4648_s18 = inlined_call_operand.hbm [shape: f32[32,128], index: 18, kind: output, shape index: {}]  }
   0x1   :  { %4652 = sst [smem:[#allocation7_spill]] %s4630_s0 }
   0x2   :  { %4653 = sst [smem:[#allocation8_spill]] %s4631_s1 }
   0x3   :  { %4654 = sst [smem:[#allocation9_spill]] %s4632_s2 }
   0x4   :  { %4655 = sst [smem:[#allocation10_spill]] %s4635_s5 }
   0x5   :  { %4656 = sst [smem:[#allocation11_spill]] %s4636_s6 }
   0x6   :  { %4657 = sst [smem:[#allocation12_spill]] %s4638_s8 }
   0x7   :  { %4658 = sst [smem:[#allocation13_spill]] %s4646_s16 }
   0x8   :  { %4659 = sst [smem:[#allocation14_spill]] %s4647_s17 }
   0x9   :  { %4660 = sst [smem:[#allocation15_spill]] %s4648_s18 }
   0xa   :  { %23 = vsyncpa [#allocation4], 0  ;;  %s3942_s27 = smov 0  }
   0xb LB: > { %4661 = sst [smem:[#allocation6_spill]] %s3838_s27  ;;  %s3948_s28 = sadd.s32 4294967295, %s3838_s27   ;;  %s3838_s27 = sphi %s3942_s27, %s29_s27  }
   0xc   : > { %p3135_p0 = scmp.ge.s32.totalorder %s3838_s27, 1  ;;  %p604_p1 = scmp.lt.s32.totalorder %s3838_s27, 3 }
   0xe   : > { %p605_p2 = pnand %p3135_p0, %p604_p1 }
   0xf   : > { %p694_p3 = scmp.lt.s32.totalorder (!%p605_p2), %s3948_s28, 1  ;;  %s4663_s8 = sld [smem:[#allocation12_spill]] (!%p605_p2) }
  0x10   : > { %608 = sbr.rel (%p605_p2) target bundleno = 2948 (0xb84), region = 92  ;;  %s4664_s6 = sld [smem:[#allocation11_spill]] (!%p605_p2) }
  0x11   : > { %p3144_p4 = scmp.ne.s32.totalorder (!%p605_p2), %s3948_s28, 0 }
  0x15   : > { %s3954_s29 = scalar_select %p694_p3, %s3948_s28, 1 }
  0x16   : > { %s4666_s1 = sld [smem:[#allocation7_spill]] (!%p3144_p4) }
  0x17   : > { %s3568_s22 = smul.u32 192, %s3954_s29  ;;  %s3481_s2 = sshll.u32 %s3954_s29, 6 }
  0x18   : > { %s3569_s23 = smul.u32 3, %s3954_s29  ;;  %s3970_s26 = scalar_lea.vmem %s4663_s8, %s3481_s2 }
  0x19   : > { %s3975_s27 = scalar_lea.vmem %s4664_s6, %s3568_s22  ;;  %s3482_s30 = sshll.u32 %s3954_s29, 7 }
  0x1a   : > { %s3984_s21 = scalar_lea.vmem %s4637_s7, %s3569_s23  ;;  %s3998_s6 = scalar_lea.vmem %s4642_s12, %s3482_s30 }
  0x1b   : > { %s3141_s18 = sshll.u32 %s3954_s29, 1  ;;  %s4009_s5 = scalar_lea.vmem %s4644_s14, %s3482_s30 }
  0x1c   : > { %s4004_s23 = scalar_lea.vmem %s4643_s13, %s3141_s18  ;;  %744 = sbr.rel (%p3144_p4) target bundleno = 215 (0xd7), region = 96 }
  0x1d   : > { %s4665_s8 = sld [smem:[#allocation8_spill]] (!%p3144_p4) }
  0x1e   : > { %s4667_s2 = sld [smem:[#allocation9_spill]] (!%p3144_p4) }
  0x21   : > { %v746_v8 = vld [vmem:[%s4666_s1 + $0x8] sm:$0xff]  ;;  %v748_v9 = vld [vmem:[%s4666_s1 + $0x18] sm:$0xff]  ;;  %vm857_vm0 = vcmask 523264   ;;  %v745_v15 = vld [vmem:[%s4666_s1] sm:$0xff] }
  0x22   : > { %v754_v10 = vpack.c.bf16 %v748_v9, %v746_v8  ;;  %v747_v16 = vld [vmem:[%s4666_s1 + $0x10] sm:$0xff]  ;;  %v749_v17 = vld [vmem:[%s4666_s1 + $0x20] sm:$0xff]  ;;  %v750_v19 = vld [vmem:[%s4666_s1 + $0x28] sm:$0xff] }
  0x23   : > { %v3491_v0 = vld [vmem:[%s4665_s8 + $0x38] sm:$0xff]  ;;  %v3490_v2 = vld [vmem:[%s4665_s8 + $0x30] sm:$0xff]  ;;  %v3489_v4 = vld [vmem:[%s4665_s8 + $0x28] sm:$0xff]  ;;  %v753_v21 = vpack.c.bf16 %v747_v16, %v745_v15 }
  0x24   : > { %v3495_v1 = vld [vmem:[%s4665_s8 + $0x58] sm:$0xff]  ;;  %864 = vmatpush.bf16.msra.mxu0 %v3491_v0  ;;  %3560 = vmatpush.bf16.msra.mxu2 %v3491_v0  ;;  %v3494_v3 = vld [vmem:[%s4665_s8 + $0x50] sm:$0xff]  ;;  %v3493_v5 = vld [vmem:[%s4665_s8 + $0x48] sm:$0xff] }
  0x25   : > { %887 = vmatpush.bf16.msra.mxu1 %v3495_v1  ;;  %v3488_v6 = vld [vmem:[%s4665_s8 + $0x20] sm:$0xff]  ;;  %v3487_v11 = vld [vmem:[%s4665_s8 + $0x18] sm:$0xff]  ;;  %v3486_v12 = vld [vmem:[%s4665_s8 + $0x10] sm:$0xff] }
  0x26   : > { %v3492_v7 = vld [vmem:[%s4665_s8 + $0x40] sm:$0xff]  ;;  %v3485_v13 = vld [vmem:[%s4665_s8 + $0x8] sm:$0xff]  ;;  %v751_v18 = vld [vmem:[%s4666_s1 + $0x30] sm:$0xff] }
  0x27   : > { %v3484_v14 = vld [vmem:[%s4665_s8] sm:$0xff]  ;;  %v752_v20 = vld [vmem:[%s4666_s1 + $0x38] sm:$0xff]  ;;  %v755_v22 = vpack.c.bf16 %v751_v18, %v749_v17  ;;  %v903_v38 = vld [vmem:[%s4633_s3 + $0x8] sm:$0xff] }
  0x28   : > { %865 = vmatpush.bf16.msra.mxu0 %v3490_v2  ;;  %3561 = vmatpush.bf16.msra.mxu2 %v3490_v2  ;;  %v756_v23 = vpack.c.bf16 %v752_v20, %v750_v19  ;;  %v3591_v26 = vld [vmem:[%s4667_s2] ss:$0 sm:$0xff] }
  0x29   : > { %888 = vmatpush.bf16.msra.mxu1 %v3494_v3  ;;  %v902_v29 = vld [vmem:[%s4633_s3] sm:$0xff] }
  0x2c   : > { %866 = vmatpush.bf16.msra.mxu0 %v3489_v4  ;;  %3562 = vmatpush.bf16.msra.mxu2 %v3489_v4 }
  0x2d   : > { %889 = vmatpush.bf16.msra.mxu1 %v3493_v5 }
  0x30   : > { %867 = vmatpush.bf16.msra.mxu0 %v3488_v6  ;;  %3563 = vmatpush.bf16.msra.mxu2 %v3488_v6 }
  0x31   : > { %890 = vmatpush.bf16.msra.mxu1 %v3492_v7 }
  0x34   : > { %3193 = vmatmul.msk.bf16.vlgmr.msra.gmra.mxu1 %vm857_vm0, %v754_v10  ;;  %868 = vmatpush.bf16.msra.mxu0 %v3487_v11 }
  0x35   : > { %3564 = vmatpush.bf16.msra.mxu2 %v3487_v11 }
  0x38   : > { %869 = vmatpush.bf16.msra.mxu0 %v3486_v12 }
  0x39   : > { %3565 = vmatpush.bf16.msra.mxu2 %v3486_v12 }
  0x3c   : > { %870 = vmatpush.bf16.msra.mxu0 %v3485_v13 }
  0x3d   : > { %3566 = vmatpush.bf16.msra.mxu2 %v3485_v13 }
  0x40   : > { %871 = vmatpush.bf16.msra.mxu0 %v3484_v14 }
  0x41   : > { %3567 = vmatpush.bf16.msra.mxu2 %v3484_v14 }
  0x43   : > { %872 = vmatmul.bf16.vlgmr.msra.gmra.mxu0 %v753_v21 }
  0x44   : > { %877 = vmatmul.bf16.vlgmr.msra.gmra.mxu2 %v755_v22  ;;  %3194 = vmatmul.msk.bf16.gmra.mxu1 %vm857_vm0, %v756_v23 }
  0xb1   : > { %v892_v24 = vpop.f32.mrf.mxu1 }
  0xb9   : > { %v894_v25 = vpop.f32.mrf.mxu1 }
  0xc0   : > { %v873_v27 = vpop.f32.mrf.mxu0 }
  0xc1   : > { %v874_v28 = vadd.f32 %v3591_v26, %v873_v27  ;;  %v897_v32 = vpop.f32.mrf.mxu1 }
  0xc3   : > { %v893_v30 = vadd.f32 %v892_v24, %v874_v28 }
  0xc5   : > { %v904_v31 = vadd.f32 %v902_v29, %v893_v30 }
  0xc7   : > { %908 = vst [vmem:[#allocation2 + $0x10] sm:$0xff] %v904_v31  ;;  %v878_v33 = vpop.f32.mrf.mxu2 }
  0xc8   : > { %v879_v34 = vadd.f32 %v3591_v26, %v878_v33  ;;  %v875_v35 = vpop.f32.mrf.mxu0 }
  0xc9   : > { %v876_v36 = vadd.f32 %v3591_v26, %v875_v35  ;;  %v899_v44 = vpop.f32.mrf.mxu1 }
  0xca   : > { %v898_v37 = vadd.f32 %v897_v32, %v879_v34 }
  0xcb   : > { %v895_v39 = vadd.f32 %v894_v25, %v876_v36 }
  0xcc   : > { %v906_v40 = vadd.f32 %v902_v29, %v898_v37 }
  0xcd   : > { %v905_v41 = vadd.f32 %v903_v38, %v895_v39 }
  0xce   : > { %910 = vst [vmem:[#allocation2 + $0x18] sm:$0xff] %v906_v40 }
  0xcf   : > { %909 = vst [vmem:[#allocation2] sm:$0xff] %v905_v41  ;;  %v880_v42 = vpop.f32.mrf.mxu2 }
  0xd0   : > { %v881_v43 = vadd.f32 %v3591_v26, %v880_v42 }
  0xd2   : > { %v900_v45 = vadd.f32 %v899_v44, %v881_v43 }
  0xd4   : > { %v907_v46 = vadd.f32 %v903_v38, %v900_v45 }
  0xd6   : > { %911 = vst [vmem:[#allocation2 + $0x8] sm:$0xff] %v907_v46 }
  0xd7 PF: > { %v912_v47 = vld [vmem:[#allocation2 + $0x10] sm:$0xff]  ;;  %v913_v48 = vld [vmem:[#allocation2] sm:$0xff]  ;;  %v3840_v49 = vmov 128.0   ;;  %v3281_v0 = vld [vmem:[%s3975_s27 + $0xa8] sm:$0xf]  ;;  %s4668_s30 = scalar_lea.vmem %s4634_s4, %s3954_s29  ;;  %s4669_s16 = sld [smem:[#allocation10_spill]] }
  0xd8   : > { %918 = vadd.xlane.f32.xlu0 %v912_v47  ;;  %3688 = vrcp.f32 %v3840_v49  ;;  %v3518_v1 = vld [vmem:[%s3975_s27 + $0xb0] sm:$0xf0]  ;;  %v3517_v2 = vld [vmem:[%s3975_s27 + $0xac] sm:$0xf]  ;;  %v3283_v4 = vld [vmem:[%s3975_s27 + $0xb4] sm:$0xf0]  ;;  %s4671_s0 = scalar_lea.vmem %s4639_s9, %s3954_s29  ;;  %s4673_s19 = scalar_lea.vmem %s4641_s11, %s3954_s29 }
  0xd9   : > { %v3282_v3 = vor.u32 %v3518_v1, %v3281_v0  ;;  %v3289_v5 = vld [vmem:[%s3975_s27 + $0xb0] sm:$0xf]  ;;  %v3519_v6 = vld [vmem:[%s3975_s27 + $0xb8] sm:$0xf0]  ;;  %v3286_v7 = vor.u32 %v3517_v2, %v3283_v4  ;;  %v3514_v11 = vld [vmem:[%s3975_s27 + $0x94] sm:$0xf]  ;;  %s4674_s20 = scalar_lea.vmem %s4645_s15, %s3954_s29 }
  0xda   : > { %v3290_v8 = vor.u32 %v3519_v6, %v3289_v5  ;;  %v3269_v9 = vld [vmem:[%s3975_s27 + $0x90] sm:$0xf]  ;;  %v3515_v10 = vld [vmem:[%s3975_s27 + $0x98] sm:$0xf0]  ;;  %v3271_v13 = vld [vmem:[%s3975_s27 + $0x9c] sm:$0xf0] }
  0xdb   : > { %1189 = vmatpush.bf16.msra.mxu0 %v3282_v3  ;;  %1208 = vmatpush.bf16.msra.mxu1 %v3286_v7  ;;  %v3270_v12 = vor.u32 %v3515_v10, %v3269_v9  ;;  %v3277_v14 = vld [vmem:[%s3975_s27 + $0x98] sm:$0xf]  ;;  %v3516_v15 = vld [vmem:[%s3975_s27 + $0xa0] sm:$0xf0]  ;;  %v3274_v16 = vor.u32 %v3514_v11, %v3271_v13  ;;  %v3511_v20 = vld [vmem:[%s3975_s27 + $0x7c] sm:$0xf] }
  0xdc   : > { %1227 = vmatpush.bf16.msra.mxu2 %v3290_v8  ;;  %v3278_v17 = vor.u32 %v3516_v15, %v3277_v14  ;;  %v3257_v18 = vld [vmem:[%s3975_s27 + $0x78] sm:$0xf]  ;;  %v3512_v19 = vld [vmem:[%s3975_s27 + $0x80] sm:$0xf0]  ;;  %v3259_v22 = vld [vmem:[%s3975_s27 + $0x84] sm:$0xf0] }
  0xdd   : > { %v3258_v21 = vor.u32 %v3512_v19, %v3257_v18  ;;  %v3265_v23 = vld [vmem:[%s3975_s27 + $0x80] sm:$0xf]  ;;  %v3513_v24 = vld [vmem:[%s3975_s27 + $0x88] sm:$0xf0]  ;;  %v3262_v25 = vor.u32 %v3511_v20, %v3259_v22  ;;  %v3508_v29 = vld [vmem:[%s3975_s27 + $0x64] sm:$0xf]  ;;  %s4670_s24 = scalar_lea.vmem %s4669_s16, %s3954_s29 }
  0xde   : > { %v3689_v50 = vpop.eup %3688  ;;  %v3266_v26 = vor.u32 %v3513_v24, %v3265_v23  ;;  %v3245_v27 = vld [vmem:[%s3975_s27 + $0x60] sm:$0xf]  ;;  %v3509_v28 = vld [vmem:[%s3975_s27 + $0x68] sm:$0xf0]  ;;  %v3247_v31 = vld [vmem:[%s3975_s27 + $0x6c] sm:$0xf0] }
  0xdf   : > { %v927_v51 = vmul.f32 128.0, %v3689_v50  ;;  %vm931_vm1 = vweird.f32 %v3689_v50  ;;  %1190 = vmatpush.bf16.msra.mxu0 %v3270_v12  ;;  %1209 = vmatpush.bf16.msra.mxu1 %v3274_v16  ;;  %v3246_v30 = vor.u32 %v3509_v28, %v3245_v27  ;;  %v3253_v32 = vld [vmem:[%s3975_s27 + $0x68] sm:$0xf]  ;;  %v3510_v33 = vld [vmem:[%s3975_s27 + $0x70] sm:$0xf0]  ;;  %v3250_v34 = vor.u32 %v3508_v29, %v3247_v31  ;;  %s3842_s2 = smov 96  }
  0xe0   : > { %920 = vadd.xlane.f32.xlu0 %v913_v48  ;;  %1228 = vmatpush.bf16.msra.mxu2 %v3278_v17  ;;  %v3254_v35 = vor.u32 %v3510_v33, %v3253_v32  ;;  %v3233_v36 = vld [vmem:[%s3975_s27 + $0x48] sm:$0xf]  ;;  %v3506_v37 = vld [vmem:[%s3975_s27 + $0x50] sm:$0xf0]  ;;  %v3505_v38 = vld [vmem:[%s3975_s27 + $0x4c] sm:$0xf] }
  0xe1   : > { %v928_v52 = vsub.f32 1.0, %v927_v51  ;;  %v3234_v39 = vor.u32 %v3506_v37, %v3233_v36  ;;  %v3235_v40 = vld [vmem:[%s3975_s27 + $0x54] sm:$0xf0]  ;;  %v3241_v41 = vld [vmem:[%s3975_s27 + $0x50] sm:$0xf]  ;;  %vm1356_vm8 = vcmask 261120  }
  0xe2   : > { %v3507_v42 = vld [vmem:[%s3975_s27 + $0x58] sm:$0xf0]  ;;  %v3238_v43 = vor.u32 %v3505_v38, %v3235_v40  ;;  %v3221_v45 = vld [vmem:[%s3975_s27 + $0x30] sm:$0xf]  ;;  %v3223_v49 = vld [vmem:[%s3975_s27 + $0x3c] sm:$0xf0] }
  0xe3   : > { %v929_v53 = vmul.f32 %v3689_v50, %v928_v52  ;;  %1191 = vmatpush.bf16.msra.mxu0 %v3258_v21  ;;  %1210 = vmatpush.bf16.msra.mxu1 %v3262_v25  ;;  %v3242_v44 = vor.u32 %v3507_v42, %v3241_v41  ;;  %v3503_v46 = vld [vmem:[%s3975_s27 + $0x38] sm:$0xf0]  ;;  %v3504_v51 = vld [vmem:[%s3975_s27 + $0x40] sm:$0xf0]  ;;  %v3197_v2 = vld [vmem:[%s3975_s27] sm:$0xf] }
  0xe4   : > { %1229 = vmatpush.bf16.msra.mxu2 %v3266_v26  ;;  %v3497_v3 = vld [vmem:[%s3975_s27 + $0x8] sm:$0xf0]  ;;  %v3496_v4 = vld [vmem:[%s3975_s27 + $0x4] sm:$0xf]  ;;  %v3199_v7 = vld [vmem:[%s3975_s27 + $0xc] sm:$0xf0] }
  0xe5   : > { %v930_v54 = vadd.f32 %v3689_v50, %v929_v53  ;;  %v3198_v6 = vor.u32 %v3497_v3, %v3197_v2  ;;  %v3205_v8 = vld [vmem:[%s3975_s27 + $0x8] sm:$0xf]  ;;  %v3498_v9 = vld [vmem:[%s3975_s27 + $0x10] sm:$0xf0]  ;;  %v3202_v11 = vor.u32 %v3496_v4, %v3199_v7  ;;  %s3843_s22 = smov 32   ;;  %vm1475_vm9 = vcmask 130048  }
  0xe6   : > { %v3206_v12 = vor.u32 %v3498_v9, %v3205_v8  ;;  %p3475_p5 = scmp.ge.s32.totalorder %s3948_s28, 1 }
  0xe7   : > { %v4087_v55 = vsel %vm931_vm1, %v3689_v50, %v930_v54  ;;  %1192 = vmatpush.bf16.msra.mxu0 %v3246_v30  ;;  %1211 = vmatpush.bf16.msra.mxu1 %v3250_v34  ;;  %v3229_v50 = vld [vmem:[%s3975_s27 + $0x38] sm:$0xf]  ;;  %v4155_v30 = vld [vmem:[%s4668_s30] ss:$0 sm:$0xff] }
  0xe8   : > { %1230 = vmatpush.bf16.msra.mxu2 %v3254_v35  ;;  %v3230_v53 = vor.u32 %v3504_v51, %v3229_v50  ;;  %v3209_v54 = vld [vmem:[%s3975_s27 + $0x18] sm:$0xf] }
  0xeb   : > { %1193 = vmatpush.bf16.msra.mxu0 %v3234_v39  ;;  %1212 = vmatpush.bf16.msra.mxu1 %v3238_v43  ;;  %v1053_v39 = vld [vmem:[%s3984_s21] sm:$0x7]  ;;  %s3841_s21 = smov 64  }
  0xec   : > { %1231 = vmatpush.bf16.msra.mxu2 %v3242_v44  ;;  %v4170_v41 = vperm.slane %v1053_v39, 1  ;;  %v4172_v42 = vperm.slane %v1053_v39, 0 }
  0xf0   : > { %1232 = vmatpush.bf16.msra.mxu2 %v3230_v53 }
 0x14b   : > { %v919_v56 = vpop.xlane.xlu0 %918 }
 0x14c   : > { %v933_v57 = vmul.f32 %v4087_v55, %v919_v56  ;;  %v3500_v56 = vld [vmem:[%s3975_s27 + $0x20] sm:$0xf0] }
 0x14e   : > { %v4090_v58 = vsub.f32 %v912_v47, %v933_v57  ;;  %v3502_v47 = vld [vmem:[%s3975_s27 + $0x34] sm:$0xf]  ;;  %v3499_v57 = vld [vmem:[%s3975_s27 + $0x1c] sm:$0xf] }
 0x14f   : > { %v3226_v52 = vor.u32 %v3502_v47, %v3223_v49 }
 0x150   : > { %v941_v59 = vmul.f32 %v4090_v58, %v4090_v58 }
 0x151   : > { %1213 = vmatpush.bf16.msra.mxu1 %v3226_v52 }
 0x152   : > { %945 = vadd.xlane.f32.xlu1 %v941_v59  ;;  %v3210_v59 = vor.u32 %v3500_v56, %v3209_v54 }
 0x153   : > { %v921_v60 = vpop.xlane.xlu0 %920 }
 0x154   : > { %v934_v61 = vmul.f32 %v4087_v55, %v921_v60  ;;  %v3211_v60 = vld [vmem:[%s3975_s27 + $0x24] sm:$0xf0] }
 0x155   : > { %v3214_v0 = vor.u32 %v3499_v57, %v3211_v60 }
 0x156   : > { %v4095_v62 = vsub.f32 %v913_v48, %v934_v61  ;;  %v3222_v48 = vor.u32 %v3503_v46, %v3221_v45  ;;  %v3217_v61 = vld [vmem:[%s3975_s27 + $0x20] sm:$0xf]  ;;  %v4175_v45 = vperm.slane %v1053_v39, 2 }
 0x157   : > { %1214 = vmatpush.bf16.msra.mxu1 %v3214_v0 }
 0x158   : > { %v942_v63 = vmul.f32 %v4095_v62, %v4095_v62  ;;  %1194 = vmatpush.bf16.msra.mxu0 %v3222_v48 }
 0x15a   : > { %947 = vadd.xlane.f32.xlu1 %v942_v63  ;;  %v3501_v63 = vld [vmem:[%s3975_s27 + $0x28] sm:$0xf0]  ;;  %s4672_s27 = scalar_lea.vmem %s4640_s10, %s3954_s29 }
 0x15b   : > { %v3218_v1 = vor.u32 %v3501_v63, %v3217_v61  ;;  %1215 = vmatpush.bf16.msra.mxu1 %v3202_v11 }
 0x15c   : > { %1195 = vmatpush.bf16.msra.mxu0 %v3210_v59 }
 0x15d   : > { %1233 = vmatpush.bf16.msra.mxu2 %v3218_v1 }
 0x160   : > { %1196 = vmatpush.bf16.msra.mxu0 %v3198_v6 }
 0x161   : > { %1234 = vmatpush.bf16.msra.mxu2 %v3206_v12  ;;  %v4192_v12 = vld [vmem:[#allocation2 + $0x8] sm:$0xff] }
 0x1c5   : > { %v946_v5 = vpop.xlane.xlu1 %945 }
 0x1c6   : > { %v953_v10 = vmul.f32 %v946_v5, %v4087_v55 }
 0x1c8   : > { %v957_v13 = vadd.f32 1e-06, %v953_v10 }
 0x1ca   : > { %3690 = vrsqrt.f32 %v957_v13  ;;  %vm967_vm3 = vweird.f32 %v957_v13 }
 0x1cd   : > { %v948_v14 = vpop.xlane.xlu1 %947 }
 0x1ce   : > { %v954_v15 = vmul.f32 %v948_v14, %v4087_v55 }
 0x1d0   : > { %v3691_v16 = vpop.eup %3690  ;;  %v958_v17 = vadd.f32 1e-06, %v954_v15 }
 0x1d1   : > { %v962_v18 = vmul.f32 %v3691_v16, %v957_v13  ;;  %vm968_vm2 = vweird.f32 %v3691_v16 }
 0x1d2   : > { %3692 = vrsqrt.f32 %v958_v17  ;;  %vm969_vm4 = vmor %vm967_vm3, %vm968_vm2  ;;  %vm977_vm6 = vweird.f32 %v958_v17 }
 0x1d3   : > { %v963_v19 = vmul.f32 %v3691_v16, %v962_v18 }
 0x1d5   : > { %v964_v20 = vmul.f32 0.5, %v963_v19 }
 0x1d7   : > { %v965_v21 = vsub.f32 1.5, %v964_v20 }
 0x1d8   : > { %v3693_v22 = vpop.eup %3692 }
 0x1d9   : > { %v966_v23 = vmul.f32 %v3691_v16, %v965_v21  ;;  %v972_v24 = vmul.f32 %v3693_v22, %v958_v17  ;;  %vm978_vm5 = vweird.f32 %v3693_v22 }
 0x1da   : > { %vm979_vm7 = vmor %vm977_vm6, %vm978_vm5 }
 0x1db   : > { %v973_v25 = vmul.f32 %v3693_v22, %v972_v24  ;;  %v970_v26 = vsel %vm969_vm4, %v3691_v16, %v966_v23 }
 0x1dc   : > { %v1001_v29 = vmul.f32 %v970_v26, %v4090_v58  ;;  %v4164_v58 = vld [vmem:[%s4670_s24] ss:$0 sm:$0xff] }
 0x1dd   : > { %v974_v27 = vmul.f32 0.5, %v973_v25  ;;  %v4196_v25 = vld [vmem:[#allocation2 + $0x18] sm:$0xff] }
 0x1de   : > { %v1008_v34 = vmul.f32 %v4155_v30, %v1001_v29 }
 0x1df   : > { %v975_v28 = vsub.f32 1.5, %v974_v27 }
 0x1e0   : > { %v1015_v36 = vadd.f32 %v4164_v58, %v1008_v34 }
 0x1e1   : > { %v976_v31 = vmul.f32 %v3693_v22, %v975_v28 }
 0x1e3   : > { %v980_v32 = vsel %vm979_vm7, %v3693_v22, %v976_v31 }
 0x1e4   : > { %v1002_v33 = vmul.f32 %v980_v32, %v4095_v62 }
 0x1e6   : > { %v1009_v35 = vmul.f32 %v4155_v30, %v1002_v33 }
 0x1e8   : > { %v1016_v37 = vadd.f32 %v4164_v58, %v1009_v35 }
 0x1ea   : > { %v1019_v38 = vpack.c.bf16 %v1016_v37, %v1015_v36 }
 0x1ec   : > { %1197 = vmatmul.bf16.vlgmr.msra.gmra.mxu0 %v1019_v38  ;;  %1216 = vmatmul.bf16.vlgmr.msra.gmra.mxu1 %v1019_v38 }
 0x1ed   : > { %1235 = vmatmul.bf16.vlgmr.msra.gmra.mxu2 %v1019_v38 }
 0x269   : > { %v1198_v62 = vpop.f32.mrf.mxu0  ;;  %v1217_v40 = vpop.f32.mrf.mxu1 }
 0x26a   : > { %v1218_v43 = vadd.f32 %v1217_v40, %v4170_v41  ;;  %v1199_v48 = vadd.f32 %v1198_v62, %v4172_v42 }
 0x26c   : > { %v1310_v51 = vpack.c.bf16 %v1218_v43, %v1218_v43  ;;  %v1282_v3 = vpack.c.bf16 %v1199_v48, %v1199_v48 }
 0x26e   : > { %v1353_v57 = vunpack.c.l.b16 %v1310_v51  ;;  %v1348_v9 = vunpack.c.l.b16 %v1282_v3 }
 0x270   : > { %v1236_v44 = vpop.f32.mrf.mxu2 }
 0x271   : > { %v1200_v46 = vpop.f32.mrf.mxu0  ;;  %v1219_v47 = vpop.f32.mrf.mxu1  ;;  %v1237_v56 = vadd.f32 %v1236_v44, %v4175_v45 }
 0x272   : > { %v1201_v49 = vadd.f32 %v1200_v46, %v4172_v42  ;;  %v1220_v50 = vadd.f32 %v1219_v47, %v4170_v41 }
 0x273   : > { %v1338_v1 = vpack.c.bf16 %v1237_v56, %v1237_v56 }
 0x274   : > { %v3602_v52 = vpack.i.bf16 %v1220_v50, %v1218_v43  ;;  %v3607_v53 = vpack.i.bf16 %v1201_v49, %v1199_v48  ;;  %v1311_v54 = vpack.c.bf16 %v1220_v50, %v1220_v50  ;;  %v1283_v63 = vpack.c.bf16 %v1201_v49, %v1201_v49 }
 0x275   : > { %v1579_v7 = vunpack.c.l.b16 %v1338_v1 }
 0x276   : > { %3603 = vrot.lane.b32.xlu0 %v3602_v52, %s3841_s21  ;;  %3593 = vrot.lane.b32.xlu2 %v3602_v52, %s3842_s2  ;;  %v1354_v59 = vunpack.c.l.b16 %v1311_v54  ;;  %v1349_v6 = vunpack.c.l.b16 %v1283_v63 }
 0x277   : > { %3608 = vrot.lane.b32.xlu1 %v3607_v53, %s3841_s21 }
 0x278   : > { %v1238_v60 = vpop.f32.mrf.mxu2  ;;  %v1355_v61 = vpack.c.b16 %v1354_v59, %v1353_v57  ;;  %v1350_v11 = vpack.c.b16 %v1349_v6, %v1348_v9 }
 0x279   : > { %v1239_v0 = vadd.f32 %v1238_v60, %v4175_v45 }
 0x27a   : > { %v1361_v2 = vsel %vm1356_vm8, %v1355_v61, 0 }
 0x27b   : > { %1370 = vmatpush.bf16.xpose.msra.mxu3 %v1361_v2  ;;  %v1339_v4 = vpack.c.bf16 %v1239_v0, %v1239_v0  ;;  %v4186_v5 = vpack.i.bf16 %v1239_v0, %v1237_v56 }
 0x27d   : > { %v1580_v8 = vunpack.c.l.b16 %v1339_v4 }
 0x27e   : > { %3598 = vrot.lane.b32.xlu2 %v3607_v53, %s3842_s2 }
 0x27f   : > { %v1581_v10 = vpack.c.b16 %v1580_v8, %v1579_v7 }
 0x281   : > { %1593 = vmatpush.bf16.msrb.mxu0 %v1581_v10 }
 0x282   : > { %3291 = vmatmul.msk.bf16.vlgmr.msra.gmra.mxu3 %vm1356_vm8, %v1350_v11 }
 0x286   : > { %3613 = vrot.lane.b32.xlu2 %v3602_v52, %s3843_s22 }
 0x28e   : > { %3618 = vrot.lane.b32.xlu2 %v3607_v53, %s3843_s22 }
 0x2a0   : > { %924 = vadd.xlane.f32.xlu0 %v4192_v12 }
 0x2b7   : > { %922 = vadd.xlane.f32.xlu2 %v4196_v25 }
 0x2d0   : > { %v3594_v13 = vpop.permute.xlu2 %3593 }
 0x2d1   : > { %v3596_v14 = vunpack.i.h.bf16 %v3594_v13  ;;  %v3595_v15 = vunpack.i.l.bf16 %v3594_v13 }
 0x2d3   : > { %v1313_v16 = vpack.c.bf16 %v3596_v14, %v3596_v14  ;;  %v1312_v17 = vpack.c.bf16 %v3595_v15, %v3595_v15 }
 0x2d5   : > { %v1385_v18 = vunpack.c.l.b16 %v1313_v16  ;;  %v1384_v19 = vunpack.c.l.b16 %v1312_v17 }
 0x2d7   : > { %v1386_v20 = vpack.c.b16 %v1385_v18, %v1384_v19 }
 0x2d8   : > { %v3599_v21 = vpop.permute.xlu2 %3598 }
 0x2d9   : > { %v3601_v22 = vunpack.i.h.bf16 %v3599_v21  ;;  %v3600_v23 = vunpack.i.l.bf16 %v3599_v21  ;;  %v1391_v24 = vsel %vm1356_vm8, %v1386_v20, 0 }
 0x2da   : > { %1400 = vmatpush.bf16.xpose.msrb.mxu3 %v1391_v24 }
 0x2db   : > { %v1285_v26 = vpack.c.bf16 %v3601_v22, %v3601_v22  ;;  %v1284_v27 = vpack.c.bf16 %v3600_v23, %v3600_v23 }
 0x2dd   : > { %v1380_v28 = vunpack.c.l.b16 %v1285_v26  ;;  %v1379_v29 = vunpack.c.l.b16 %v1284_v27 }
 0x2df   : > { %v1381_v31 = vpack.c.b16 %v1380_v28, %v1379_v29 }
 0x2e0   : > { %v3614_v32 = vpop.permute.xlu2 %3613 }
 0x2e1   : > { %3292 = vmatmul.msk.bf16.vlgmr.msrb.gmra.mxu3 %vm1356_vm8, %v1381_v31  ;;  %v3616_v33 = vunpack.i.h.bf16 %v3614_v32  ;;  %v3615_v34 = vunpack.i.l.bf16 %v3614_v32 }
 0x2e3   : > { %v1317_v35 = vpack.c.bf16 %v3616_v33, %v3616_v33  ;;  %v1316_v36 = vpack.c.bf16 %v3615_v34, %v3615_v34 }
 0x2e5   : > { %v1445_v40 = vunpack.c.l.b16 %v1317_v35  ;;  %v1444_v43 = vunpack.c.l.b16 %v1316_v36 }
 0x2e7   : > { %v1446_v51 = vpack.c.b16 %v1445_v40, %v1444_v43 }
 0x2e8   : > { %v3604_v37 = vpop.permute.xlu0 %3603  ;;  %v3619_v63 = vpop.permute.xlu2 %3618 }
 0x2e9   : > { %v3606_v38 = vunpack.i.h.bf16 %v3604_v37  ;;  %v3605_v39 = vunpack.i.l.bf16 %v3604_v37  ;;  %v3609_v62 = vpop.permute.xlu1 %3608  ;;  %v1451_v57 = vsel %vm1356_vm8, %v1446_v51, 0  ;;  %v3621_v0 = vunpack.i.h.bf16 %v3619_v63 }
 0x2ea   : > { %v3611_v47 = vunpack.i.h.bf16 %v3609_v62  ;;  %v3610_v48 = vunpack.i.l.bf16 %v3609_v62  ;;  %v3620_v1 = vunpack.i.l.bf16 %v3619_v63 }
 0x2eb   : > { %v1315_v44 = vpack.c.bf16 %v3606_v38, %v3606_v38  ;;  %v1314_v46 = vpack.c.bf16 %v3605_v39, %v3605_v39  ;;  %v1289_v2 = vpack.c.bf16 %v3621_v0, %v3621_v0 }
 0x2ec   : > { %v1287_v53 = vpack.c.bf16 %v3611_v47, %v3611_v47  ;;  %v1286_v54 = vpack.c.bf16 %v3610_v48, %v3610_v48  ;;  %v1288_v3 = vpack.c.bf16 %v3620_v1, %v3620_v1 }
 0x2ed   : > { %v1415_v49 = vunpack.c.l.b16 %v1315_v44  ;;  %v1414_v50 = vunpack.c.l.b16 %v1314_v46  ;;  %v1440_v4 = vunpack.c.l.b16 %v1289_v2 }
 0x2ee   : > { %v1410_v59 = vunpack.c.l.b16 %v1287_v53  ;;  %v1409_v60 = vunpack.c.l.b16 %v1286_v54  ;;  %v1439_v6 = vunpack.c.l.b16 %v1288_v3 }
 0x2ef   : > { %v1416_v52 = vpack.c.b16 %v1415_v49, %v1414_v50 }
 0x2f0   : > { %v1411_v61 = vpack.c.b16 %v1410_v59, %v1409_v60  ;;  %v1441_v9 = vpack.c.b16 %v1440_v4, %v1439_v6 }
 0x2f1   : > { %v1421_v56 = vsel %vm1356_vm8, %v1416_v52, 0 }
 0x2f2   : > { %1430 = vmatpush.bf16.xpose.msra.mxu3 %v1421_v56 }
 0x2f9   : > { %3293 = vmatmul.msk.bf16.vlgmr.msra.gmra.mxu3 %vm1356_vm8, %v1411_v61 }
 0x2fa   : > { %1460 = vmatpush.bf16.xpose.msrb.mxu3 %v1451_v57 }
 0x305   : > { %v1372_v7 = vpop.f32.mrf.mxu3 }
 0x306   : > { %v4203_v8 = vmul.f32 0.17677669, %v1372_v7 }
 0x308   : > { %v1476_v10 = vsel %vm1475_vm9, %v4203_v8, -inf }
 0x309   : > { %3294 = vmatmul.msk.bf16.vlgmr.msrb.gmra.mxu3 %vm1356_vm8, %v1441_v9  ;;  %1477 = vmax.xlane.f32.xlu2 %v1476_v10 }
 0x30d   : > { %v1374_v16 = vpop.f32.mrf.mxu3 }
 0x30e   : > { %v4222_v29 = vmul.f32 0.17677669, %v1374_v16 }
 0x313   : > { %v925_v11 = vpop.xlane.xlu0 %924 }
 0x314   : > { %v936_v13 = vmul.f32 %v4087_v55, %v925_v11 }
 0x316   : > { %v4210_v14 = vsub.f32 %v4192_v12, %v936_v13 }
 0x318   : > { %v944_v15 = vmul.f32 %v4210_v14, %v4210_v14 }
 0x31a   : > { %951 = vadd.xlane.f32.xlu0 %v944_v15 }
 0x32a   : > { %v923_v19 = vpop.xlane.xlu2 %922 }
 0x32b   : > { %v935_v20 = vmul.f32 %v4087_v55, %v923_v19 }
 0x32d   : > { %v4217_v24 = vsub.f32 %v4196_v25, %v935_v20  ;;  %v1479_v25 = vsel %vm1475_vm9, %v4222_v29, -inf }
 0x32f   : > { %v943_v26 = vmul.f32 %v4217_v24, %v4217_v24 }
 0x364   : > { %v1402_v17 = vpop.f32.mrf.mxu3 }
 0x365   : > { %v4231_v36 = vmul.f32 0.17677669, %v1402_v17 }
 0x367   : > { %v1482_v62 = vsel %vm1475_vm9, %v4231_v36, -inf }
 0x36c   : > { %v1404_v18 = vpop.f32.mrf.mxu3 }
 0x36d   : > { %v4224_v31 = vmul.f32 0.17677669, %v1404_v18 }
 0x36f   : > { %v1485_v34 = vsel %vm1475_vm9, %v4224_v31, -inf }
 0x37c   : > { %v1432_v21 = vpop.f32.mrf.mxu3  ;;  %v1478_v47 = vpop.xlane.xlu2 %1477 }
 0x37d   : > { %v1471_v22 = vmul.f32 0.17677669, %v1432_v21  ;;  %v1500_v20 = vsub.f32 %v4203_v8, %v1478_v47 }
 0x37f   : > { %v1488_v23 = vsel %vm1475_vm9, %v1471_v22, -inf }
 0x380   : > { %1489 = vmax.xlane.f32.xlu1 %v1488_v23 }
 0x384   : > { %v1434_v12 = vpop.f32.mrf.mxu3 }
 0x385   : > { %v1472_v27 = vmul.f32 0.17677669, %v1434_v12 }
 0x387   : > { %v1491_v28 = vsel %vm1475_vm9, %v1472_v27, -inf }
 0x388   : > { %949 = vadd.xlane.f32.xlu1 %v943_v26  ;;  %1492 = vmax.xlane.f32.xlu2 %v1491_v28 }
 0x38c   : > { %v1462_v32 = vpop.f32.mrf.mxu3 }
 0x38d   : > { %v1473_v33 = vmul.f32 0.17677669, %v1462_v32  ;;  %v952_v40 = vpop.xlane.xlu0 %951 }
 0x38e   : > { %v956_v43 = vmul.f32 %v952_v40, %v4087_v55 }
 0x38f   : > { %v1494_v35 = vsel %vm1475_vm9, %v1473_v33, -inf }
 0x390   : > { %1480 = vmax.xlane.f32.xlu1 %v1479_v25  ;;  %1486 = vmax.xlane.f32.xlu2 %v1485_v34  ;;  %v960_v44 = vadd.f32 1e-06, %v956_v43 }
 0x391   : > { %1495 = vmax.xlane.f32.xlu0 %v1494_v35 }
 0x392   : > { %3694 = vrsqrt.f32 %v960_v44  ;;  %vm997_vm10 = vweird.f32 %v960_v44 }
 0x394   : > { %v1464_v37 = vpop.f32.mrf.mxu3 }
 0x395   : > { %v1474_v38 = vmul.f32 0.17677669, %v1464_v37 }
 0x397   : > { %v1497_v39 = vsel %vm1475_vm9, %v1474_v38, -inf }
 0x398   : > { %1498 = vmax.xlane.f32.xlu2 %v1497_v39  ;;  %v3695_v46 = vpop.eup %3694 }
 0x399   : > { %1483 = vmax.xlane.f32.xlu0 %v1482_v62  ;;  %v992_v50 = vmul.f32 %v3695_v46, %v960_v44  ;;  %vm998_vm11 = vweird.f32 %v3695_v46 }
 0x39a   : > { %vm999_vm12 = vmor %vm997_vm10, %vm998_vm11 }
 0x39b   : > { %v993_v52 = vmul.f32 %v3695_v46, %v992_v50 }
 0x39d   : > { %v994_v60 = vmul.f32 0.5, %v993_v52 }
 0x39f   : > { %v995_v1 = vsub.f32 1.5, %v994_v60 }
 0x3a1   : > { %v996_v7 = vmul.f32 %v3695_v46, %v995_v1 }
 0x3a3   : > { %v1000_v16 = vsel %vm999_vm12, %v3695_v46, %v996_v7 }
 0x3a4   : > { %v1004_v21 = vmul.f32 %v1000_v16, %v4210_v14 }
 0x3b0   : > { %3628 = vrot.lane.b32.xlu2 %v4186_v5, %s3843_s22 }
 0x3f3   : > { %v1490_v48 = vpop.xlane.xlu1 %1489 }
 0x3f4   : > { %v1504_v49 = vsub.f32 %v1471_v22, %v1490_v48 }
 0x3f6   : > { %v1516_v51 = vmul.f32 1.442695, %v1504_v49 }
 0x3f8   : > { %3696 = vpow2.f32 %v1516_v51 }
 0x3fb   : > { %v950_v53 = vpop.xlane.xlu1 %949  ;;  %v1493_v54 = vpop.xlane.xlu2 %1492 }
 0x3fc   : > { %v955_v56 = vmul.f32 %v950_v53, %v4087_v55  ;;  %v1505_v57 = vsub.f32 %v1472_v27, %v1493_v54  ;;  %v1508_v27 = vmul.f32 1.442695, %v1500_v20 }
 0x3fe   : > { %v4240_v59 = vpop.eup %3696  ;;  %v959_v61 = vadd.f32 1e-06, %v955_v56  ;;  %v1518_v63 = vmul.f32 1.442695, %v1505_v57 }
 0x3ff   : > { %v1536_v0 = vsel %vm1475_vm9, %v4240_v59, 0.0 }
 0x400   : > { %3698 = vrsqrt.f32 %v959_v61  ;;  %1537 = vadd.xlane.f32.xlu1 %v1536_v0  ;;  %vm987_vm13 = vweird.f32 %v959_v61 }
 0x401   : > { %3700 = vpow2.f32 %v1518_v63 }
 0x403   : > { %v4244_v2 = vpop.xlane.xlu2 %1486  ;;  %v1481_v8 = vpop.xlane.xlu1 %1480 }
 0x404   : > { %v1496_v3 = vpop.xlane.xlu0 %1495  ;;  %v1501_v62 = vsub.f32 %v4222_v29, %v1481_v8 }
 0x405   : > { %v1506_v4 = vsub.f32 %v1473_v33, %v1496_v3  ;;  %v1011_v33 = vmul.f32 %v4155_v30, %v1004_v21 }
 0x406   : > { %v3699_v6 = vpop.eup %3698  ;;  %v1510_v49 = vmul.f32 1.442695, %v1501_v62 }
 0x407   : > { %v4246_v9 = vpop.eup %3700  ;;  %v982_v10 = vmul.f32 %v3699_v6, %v959_v61  ;;  %v1520_v11 = vmul.f32 1.442695, %v1506_v4  ;;  %vm988_vm14 = vweird.f32 %v3699_v6 }
 0x408   : > { %v1539_v13 = vsel %vm1475_vm9, %v4246_v9, 0.0  ;;  %vm989_vm15 = vmor %vm987_vm13, %vm988_vm14 }
 0x409   : > { %v983_v15 = vmul.f32 %v3699_v6, %v982_v10  ;;  %1540 = vadd.xlane.f32.xlu0 %v1539_v13  ;;  %3702 = vpow2.f32 %v1520_v11 }
 0x40b   : > { %v984_v17 = vmul.f32 0.5, %v983_v15  ;;  %v1499_v18 = vpop.xlane.xlu2 %1498 }
 0x40c   : > { %v1507_v19 = vsub.f32 %v1474_v38, %v1499_v18  ;;  %v1018_v38 = vadd.f32 %v4164_v58, %v1011_v33  ;;  %v1484_v56 = vpop.xlane.xlu0 %1483 }
 0x40d   : > { %v985_v22 = vsub.f32 1.5, %v984_v17  ;;  %v1502_v57 = vsub.f32 %v4231_v36, %v1484_v56  ;;  %v4294_v36 = vld [vmem:[%s3970_s26] sm:$0xff] }
 0x40e   : > { %v1522_v23 = vmul.f32 1.442695, %v1507_v19 }
 0x40f   : > { %v986_v12 = vmul.f32 %v3699_v6, %v985_v22  ;;  %v4252_v26 = vpop.eup %3702  ;;  %v1512_v60 = vmul.f32 1.442695, %v1502_v57 }
 0x410   : > { %3704 = vpow2.f32 %v1522_v23  ;;  %v1542_v32 = vsel %vm1475_vm9, %v4252_v26, 0.0 }
 0x411   : > { %v990_v28 = vsel %vm989_vm15, %v3699_v6, %v986_v12  ;;  %1543 = vadd.xlane.f32.xlu2 %v1542_v32  ;;  %3706 = vpow2.f32 %v1508_v27 }
 0x412   : > { %v1003_v25 = vmul.f32 %v990_v28, %v4217_v24  ;;  %3708 = vpow2.f32 %v1510_v49 }
 0x413   : > { %v3629_v34 = vpop.permute.xlu2 %3628 }
 0x414   : > { %v3631_v14 = vunpack.i.h.bf16 %v3629_v34  ;;  %v3630_v35 = vunpack.i.l.bf16 %v3629_v34  ;;  %v1010_v37 = vmul.f32 %v4155_v30, %v1003_v25 }
 0x416   : > { %v4260_v39 = vpop.eup %3704  ;;  %v1345_v40 = vpack.c.bf16 %v3631_v14, %v3631_v14  ;;  %v1344_v43 = vpack.c.bf16 %v3630_v35, %v3630_v35  ;;  %v1017_v44 = vadd.f32 %v4164_v58, %v1010_v37  ;;  %v1503_v58 = vsub.f32 %v4224_v31, %v4244_v2  ;;  %v4290_v2 = vld [vmem:[%s3970_s26 + $0x8] sm:$0xff] }
 0x417   : > { %v1545_v24 = vsel %vm1475_vm9, %v4260_v39, 0.0  ;;  %v4266_v50 = vpop.eup %3706  ;;  %1718 = vmatpush.bf16.msra.mxu0 %v4290_v2 }
 0x418   : > { %v1664_v46 = vunpack.c.l.b16 %v1345_v40  ;;  %v1663_v47 = vunpack.c.l.b16 %v1344_v43  ;;  %1546 = vadd.xlane.f32.xlu1 %v1545_v24  ;;  %v1020_v48 = vpack.c.bf16 %v1018_v38, %v1017_v44  ;;  %v1524_v29 = vsel %vm1475_vm9, %v4266_v50, 0.0  ;;  %v4274_v52 = vpop.eup %3708 }
 0x419   : > { %v1514_v51 = vmul.f32 1.442695, %v1503_v58  ;;  %v1527_v53 = vsel %vm1475_vm9, %v4274_v52, 0.0 }
 0x41a   : > { %v1665_v30 = vpack.c.b16 %v1664_v46, %v1663_v47  ;;  %1202 = vmatmul.bf16.gmra.mxu0 %v1020_v48  ;;  %1221 = vmatmul.bf16.gmra.mxu1 %v1020_v48 }
 0x41b   : > { %1240 = vmatmul.bf16.gmra.mxu2 %v1020_v48  ;;  %3710 = vpow2.f32 %v1514_v51  ;;  %1719 = vmatpush.bf16.msra.mxu0 %v4294_v36 }
 0x41c   : > { %1677 = vmatpush.bf16.msra.mxu3 %v1665_v30  ;;  %3712 = vpow2.f32 %v1512_v60 }
 0x41d   : > { %3623 = vrot.lane.b32.xlu0 %v4186_v5, %s3841_s21 }
 0x420   : > { %1525 = vadd.xlane.f32.xlu1 %v1524_v29 }
 0x421   : > { %v4280_v54 = vpop.eup %3710 }
 0x422   : > { %v1533_v31 = vsel %vm1475_vm9, %v4280_v54, 0.0  ;;  %v4285_v61 = vpop.eup %3712 }
 0x423   : > { %v1530_v63 = vsel %vm1475_vm9, %v4285_v61, 0.0 }
 0x428   : > { %1528 = vadd.xlane.f32.xlu1 %v1527_v53 }
 0x429   : > { %3633 = vrot.lane.b32.xlu2 %v4186_v5, %s3842_s2 }
 0x430   : > { %1534 = vadd.xlane.f32.xlu1 %v1533_v31 }
 0x447   : > { %1531 = vadd.xlane.f32.xlu0 %v1530_v63 }
 0x473   : > { %v1538_v0 = vpop.xlane.xlu1 %1537 }
 0x47c   : > { %v1541_v5 = vpop.xlane.xlu0 %1540 }
 0x47d   : > { %3714 = vrcp.f32 %v1541_v5 }
 0x47e   : > { %3716 = vrcp.f32 %v1538_v0 }
 0x483   : > { %v3715_v3 = vpop.eup %3714 }
 0x484   : > { %v1544_v1 = vpop.xlane.xlu2 %1543  ;;  %v3717_v4 = vpop.eup %3716  ;;  %v1561_v10 = vmul.f32 %v3715_v3, %v4246_v9 }
 0x485   : > { %3718 = vrcp.f32 %v1544_v1  ;;  %v1560_v16 = vmul.f32 %v3717_v4, %v4240_v59 }
 0x486   : > { %v1569_v23 = vpack.c.bf16 %v1561_v10, %v1561_v10 }
 0x487   : > { %v1568_v25 = vpack.c.bf16 %v1560_v16, %v1560_v16 }
 0x488   : > { %v1631_v35 = vunpack.c.l.b16 %v1569_v23 }
 0x489   : > { %v1630_v62 = vunpack.c.l.b16 %v1568_v25 }
 0x48b   : > { %v1547_v6 = vpop.xlane.xlu1 %1546  ;;  %v3719_v7 = vpop.eup %3718  ;;  %v1632_v47 = vpack.c.b16 %v1631_v35, %v1630_v62  ;;  %v4349_v35 = vld [vmem:[%s3970_s26 + $0x20] sm:$0xff] }
 0x48c   : > { %3720 = vrcp.f32 %v1547_v6  ;;  %v3634_v11 = vpop.permute.xlu2 %3633  ;;  %v1562_v17 = vmul.f32 %v3719_v7, %v4252_v26 }
 0x48d   : > { %v3636_v13 = vunpack.i.h.bf16 %v3634_v11  ;;  %v3635_v15 = vunpack.i.l.bf16 %v3634_v11 }
 0x48e   : > { %v1570_v9 = vpack.c.bf16 %v1562_v17, %v1562_v17 }
 0x48f   : > { %v3624_v18 = vpop.permute.xlu0 %3623  ;;  %v1341_v19 = vpack.c.bf16 %v3636_v13, %v3636_v13  ;;  %v1340_v20 = vpack.c.bf16 %v3635_v15, %v3635_v15 }
 0x490   : > { %v3626_v21 = vunpack.i.h.bf16 %v3624_v18  ;;  %v3625_v22 = vunpack.i.l.bf16 %v3624_v18  ;;  %v1658_v40 = vunpack.c.l.b16 %v1570_v9 }
 0x491   : > { %v1608_v27 = vunpack.c.l.b16 %v1341_v19  ;;  %v1607_v28 = vunpack.c.l.b16 %v1340_v20 }
 0x492   : > { %v3721_v12 = vpop.eup %3720  ;;  %v1343_v32 = vpack.c.bf16 %v3626_v21, %v3626_v21  ;;  %v1342_v33 = vpack.c.bf16 %v3625_v22, %v3625_v22 }
 0x493   : > { %v1563_v8 = vmul.f32 %v3721_v12, %v4260_v39  ;;  %v1526_v34 = vpop.xlane.xlu1 %1525  ;;  %v1609_v26 = vpack.c.b16 %v1608_v27, %v1607_v28 }
 0x494   : > { %v1636_v14 = vunpack.c.l.b16 %v1343_v32  ;;  %v1635_v59 = vunpack.c.l.b16 %v1342_v33  ;;  %3722 = vrcp.f32 %v1526_v34  ;;  %v4337_v34 = vld [vmem:[%s3970_s26 + $0x38] sm:$0xff] }
 0x495   : > { %v1571_v37 = vpack.c.bf16 %v1563_v8, %v1563_v8  ;;  %1621 = vmatpush.bf16.msrb.mxu1 %v1609_v26  ;;  %1820 = vmatpush.bf16.msrb.mxu3 %v4337_v34 }
 0x496   : > { %v1637_v38 = vpack.c.b16 %v1636_v14, %v1635_v59  ;;  %v4341_v14 = vld [vmem:[%s3970_s26 + $0x30] sm:$0xff] }
 0x497   : > { %v1659_v43 = vunpack.c.l.b16 %v1571_v37  ;;  %v1203_v44 = vpop.f32.mrf.mxu0  ;;  %v1222_v24 = vpop.f32.mrf.mxu1 }
 0x498   : > { %1649 = vmatpush.bf16.msrb.mxu2 %v1637_v38  ;;  %v1204_v49 = vadd.f32 %v1203_v44, %v4172_v42  ;;  %v1223_v58 = vadd.f32 %v1222_v24, %v4170_v41 }
 0x499   : > { %v1660_v46 = vpack.c.b16 %v1659_v43, %v1658_v40  ;;  %1821 = vmatpush.bf16.msrb.mxu3 %v4341_v14  ;;  %v4353_v43 = vld [vmem:[%s3970_s26 + $0x18] sm:$0xff] }
 0x49a   : > { %v3723_v48 = vpop.eup %3722  ;;  %v1854_v31 = vpack.c.bf16 %v1204_v49, %v1204_v49  ;;  %v1882_v63 = vpack.c.bf16 %v1223_v58, %v1223_v58  ;;  %1752 = vmatpush.bf16.msra.mxu1 %v4353_v43 }
 0x49b   : > { %3297 = vmatmul.msk.bf16.vlgmr.msrb.gmra.mxu2 %vm1475_vm9, %v1632_v47  ;;  %v1529_v39 = vpop.xlane.xlu1 %1528  ;;  %3298 = vmatmul.msk.bf16.vlgmr.msra.gmra.mxu3 %vm1475_vm9, %v1660_v46  ;;  %v1556_v30 = vmul.f32 %v3723_v48, %v4266_v50  ;;  %v4358_v46 = vld [vmem:[%s3970_s26 + $0x10] sm:$0xff] }
 0x49c   : > { %3724 = vrcp.f32 %v1529_v39  ;;  %v4309_v6 = vunpack.c.l.b16 %v1854_v31  ;;  %v1925_v10 = vunpack.c.l.b16 %v1882_v63 }
 0x49d   : > { %v1564_v60 = vpack.c.bf16 %v1556_v30, %v1556_v30 }
 0x49e   : > { %v1241_v29 = vpop.f32.mrf.mxu2  ;;  %1753 = vmatpush.bf16.msra.mxu1 %v4358_v46 }
 0x49f   : > { %v1205_v51 = vpop.f32.mrf.mxu0  ;;  %v1224_v53 = vpop.f32.mrf.mxu1  ;;  %v4318_v16 = vadd.f32 %v1241_v29, %v4175_v45 }
 0x4a0   : > { %v1206_v56 = vadd.f32 %v1205_v51, %v4172_v42  ;;  %v1225_v57 = vadd.f32 %v1224_v53, %v4170_v41  ;;  %v1574_v41 = vunpack.c.l.b16 %v1564_v60 }
 0x4a2   : > { %v3725_v5 = vpop.eup %3724  ;;  %v1855_v0 = vpack.c.bf16 %v1206_v56, %v1206_v56  ;;  %v3642_v1 = vpack.i.bf16 %v1225_v57, %v1223_v58  ;;  %v1883_v3 = vpack.c.bf16 %v1225_v57, %v1225_v57  ;;  %v3647_v20 = vpack.i.bf16 %v1206_v56, %v1204_v49 }
 0x4a3   : > { %v1557_v4 = vmul.f32 %v3725_v5, %v4274_v52  ;;  %v1535_v22 = vpop.xlane.xlu1 %1534 }
 0x4a4   : > { %v4311_v50 = vunpack.c.l.b16 %v1855_v0  ;;  %3643 = vrot.lane.b32.xlu2 %v3642_v1, %s3843_s22  ;;  %3638 = vrot.lane.b32.xlu1 %v3642_v1, %s3841_s21  ;;  %v1926_v7 = vunpack.c.l.b16 %v1883_v3  ;;  %3726 = vrcp.f32 %v1535_v22 }
 0x4a5   : > { %v1565_v42 = vpack.c.bf16 %v1557_v4, %v1557_v4 }
 0x4a6   : > { %v1922_v11 = vpack.c.b16 %v4311_v50, %v4309_v6  ;;  %v1243_v13 = vpop.f32.mrf.mxu2  ;;  %v1927_v17 = vpack.c.b16 %v1926_v7, %v1925_v10 }
 0x4a7   : > { %v1575_v15 = vunpack.c.l.b16 %v1565_v42  ;;  %v4321_v52 = vadd.f32 %v1243_v13, %v4175_v45 }
 0x4a8   : > { %v1932_v21 = vsel %vm1356_vm8, %v1927_v17, 0 }
 0x4a9   : > { %v1576_v18 = vpack.c.b16 %v1575_v15, %v1574_v41  ;;  %v4325_v19 = vpack.i.bf16 %v4321_v52, %v4318_v16 }
 0x4aa   : > { %v3727_v23 = vpop.eup %3726 }
 0x4ab   : > { %3295 = vmatmul.msk.bf16.vlgmr.msrb.gmra.mxu0 %vm1475_vm9, %v1576_v18  ;;  %v1559_v12 = vmul.f32 %v3727_v23, %v4280_v54  ;;  %v4345_v54 = vld [vmem:[%s3970_s26 + $0x28] sm:$0xff] }
 0x4ac   : > { %1941 = vmatpush.bf16.xpose.msrb.mxu0 %v1932_v21  ;;  %3648 = vrot.lane.b32.xlu2 %v3647_v20, %s3841_s21 }
 0x4ad   : > { %3658 = vrot.lane.b32.xlu1 %v3642_v1, %s3842_s2  ;;  %v1567_v28 = vpack.c.bf16 %v1559_v12, %v1559_v12  ;;  %1786 = vmatpush.bf16.msra.mxu2 %v4345_v54 }
 0x4af   : > { %v1603_v25 = vunpack.c.l.b16 %v1567_v28 }
 0x4b1   : > { %1787 = vmatpush.bf16.msra.mxu2 %v4349_v35 }
 0x4b4   : > { %3653 = vrot.lane.b32.xlu2 %v3647_v20, %s3843_s22 }
 0x4ba   : > { %v1532_v45 = vpop.xlane.xlu0 %1531 }
 0x4bb   : > { %3728 = vrcp.f32 %v1532_v45 }
 0x4bc   : > { %3663 = vrot.lane.b32.xlu2 %v3647_v20, %s3842_s2 }
 0x4c1   : > { %v3729_v27 = vpop.eup %3728 }
 0x4c2   : > { %v1558_v32 = vmul.f32 %v3729_v27, %v4285_v61 }
 0x4c4   : > { %v1566_v33 = vpack.c.bf16 %v1558_v32, %v1558_v32  ;;  %v1911_v32 = vpack.c.bf16 %v4321_v52, %v4321_v52 }
 0x4c6   : > { %v1602_v9 = vunpack.c.l.b16 %v1566_v33 }
 0x4c8   : > { %v1604_v8 = vpack.c.b16 %v1603_v25, %v1602_v9 }
 0x4ca   : > { %3296 = vmatmul.msk.bf16.vlgmr.msrb.gmra.mxu1 %vm1475_vm9, %v1604_v8 }
 0x4fe   : > { %v3644_v59 = vpop.permute.xlu2 %3643 }
 0x4ff   : > { %v3646_v61 = vunpack.i.h.bf16 %v3644_v59  ;;  %v3645_v26 = vunpack.i.l.bf16 %v3644_v59 }
 0x501   : > { %v1889_v37 = vpack.c.bf16 %v3646_v61, %v3646_v61  ;;  %v1888_v38 = vpack.c.bf16 %v3645_v26, %v3645_v26  ;;  %v1910_v61 = vpack.c.bf16 %v4318_v16, %v4318_v16 }
 0x503   : > { %v2016_v62 = vunpack.c.l.b16 %v1889_v37  ;;  %v2015_v40 = vunpack.c.l.b16 %v1888_v38  ;;  %v2150_v38 = vunpack.c.l.b16 %v1911_v32 }
 0x505   : > { %v2017_v44 = vpack.c.b16 %v2016_v62, %v2015_v40 }
 0x506   : > { %v3649_v5 = vpop.permute.xlu2 %3648 }
 0x507   : > { %v2022_v24 = vsel %vm1356_vm8, %v2017_v44, 0  ;;  %v3651_v33 = vunpack.i.h.bf16 %v3649_v5  ;;  %v3650_v25 = vunpack.i.l.bf16 %v3649_v5 }
 0x508   : > { %2031 = vmatpush.bf16.xpose.msra.mxu3 %v2022_v24 }
 0x509   : > { %v1859_v62 = vpack.c.bf16 %v3651_v33, %v3651_v33  ;;  %v1858_v40 = vpack.c.bf16 %v3650_v25, %v3650_v25 }
 0x50e   : > { %v3654_v28 = vpop.permute.xlu2 %3653 }
 0x50f   : > { %v3656_v9 = vunpack.i.h.bf16 %v3654_v28  ;;  %v3655_v8 = vunpack.i.l.bf16 %v3654_v28 }
 0x511   : > { %v1861_v44 = vpack.c.bf16 %v3656_v9, %v3656_v9  ;;  %v1860_v24 = vpack.c.bf16 %v3655_v8, %v3655_v8 }
 0x516   : > { %v3639_v47 = vpop.permute.xlu1 %3638 }
 0x517   : > { %v3641_v48 = vunpack.i.h.bf16 %v3639_v47  ;;  %v3640_v39 = vunpack.i.l.bf16 %v3639_v47 }
 0x519   : > { %v1887_v49 = vpack.c.bf16 %v3641_v48, %v3641_v48  ;;  %v1886_v30 = vpack.c.bf16 %v3640_v39, %v3640_v39  ;;  %v2149_v39 = vunpack.c.l.b16 %v1910_v61 }
 0x51b   : > { %v1986_v58 = vunpack.c.l.b16 %v1887_v49  ;;  %v1985_v29 = vunpack.c.l.b16 %v1886_v30  ;;  %v2151_v52 = vpack.c.b16 %v2150_v38, %v2149_v39  ;;  %v1981_v30 = vunpack.c.l.b16 %v1859_v62 }
 0x51d   : > { %v1987_v51 = vpack.c.b16 %v1986_v58, %v1985_v29  ;;  %v1980_v58 = vunpack.c.l.b16 %v1858_v40  ;;  %v2011_v29 = vunpack.c.l.b16 %v1861_v44 }
 0x51e   : > { %v1651_v53 = vpop.f32.mrf.mxu2  ;;  %v1679_v31 = vpop.f32.mrf.mxu3 }
 0x51f   : > { %v3659_v56 = vpop.permute.xlu1 %3658  ;;  %v1992_v57 = vsel %vm1356_vm8, %v1987_v51, 0  ;;  %v1688_v7 = vpack.c.bf16 %v1651_v53, %v1651_v53  ;;  %v1690_v42 = vpack.c.bf16 %v1679_v31, %v1679_v31  ;;  %v2010_v51 = vunpack.c.l.b16 %v1860_v24 }
 0x520   : > { %v3661_v60 = vunpack.i.h.bf16 %v3659_v56  ;;  %v3660_v63 = vunpack.i.l.bf16 %v3659_v56  ;;  %2001 = vmatpush.bf16.xpose.msrb.mxu2 %v1992_v57  ;;  %v1982_v16 = vpack.c.b16 %v1981_v30, %v1980_v58 }
 0x521   : > { %v1762_v21 = vunpack.c.l.b16 %v1688_v7  ;;  %v1796_v22 = vunpack.c.l.b16 %v1690_v42  ;;  %v2012_v53 = vpack.c.b16 %v2011_v29, %v2010_v51 }
 0x522   : > { %v1885_v0 = vpack.c.bf16 %v3661_v60, %v3661_v60  ;;  %v1884_v1 = vpack.c.bf16 %v3660_v63, %v3660_v63 }
 0x524   : > { %v1956_v3 = vunpack.c.l.b16 %v1885_v0  ;;  %v1955_v4 = vunpack.c.l.b16 %v1884_v1  ;;  %v3664_v1 = vpop.permute.xlu2 %3663 }
 0x526   : > { %v1957_v10 = vpack.c.b16 %v1956_v3, %v1955_v4  ;;  %v1653_v41 = vpop.f32.mrf.mxu2  ;;  %v1681_v13 = vpop.f32.mrf.mxu3  ;;  %v3666_v3 = vunpack.i.h.bf16 %v3664_v1  ;;  %v3665_v4 = vunpack.i.l.bf16 %v3664_v1 }
 0x527   : > { %v1689_v15 = vpack.c.bf16 %v1653_v41, %v1653_v41  ;;  %v1691_v17 = vpack.c.bf16 %v1681_v13, %v1681_v13 }
 0x528   : > { %v1595_v18 = vpop.f32.mrf.mxu0  ;;  %v1962_v20 = vsel %vm1356_vm8, %v1957_v10, 0  ;;  %v1857_v7 = vpack.c.bf16 %v3666_v3, %v3666_v3  ;;  %v1856_v42 = vpack.c.bf16 %v3665_v4, %v3665_v4 }
 0x529   : > { %v1763_v45 = vunpack.c.l.b16 %v1689_v15  ;;  %v1797_v23 = vunpack.c.l.b16 %v1691_v17  ;;  %1971 = vmatpush.bf16.xpose.msrb.mxu1 %v1962_v20  ;;  %v1684_v59 = vpack.c.bf16 %v1595_v18, %v1595_v18 }
 0x52a   : > { %v1951_v6 = vunpack.c.l.b16 %v1857_v7  ;;  %v1950_v50 = vunpack.c.l.b16 %v1856_v42 }
 0x52b   : > { %v1764_v12 = vpack.c.b16 %v1763_v45, %v1762_v21  ;;  %v1798_v27 = vpack.c.b16 %v1797_v23, %v1796_v22  ;;  %v1694_v47 = vunpack.c.l.b16 %v1684_v59 }
 0x52d   : > { %3325 = vmatmul.msk.bf16.vlgmr.msra.gmra.mxu2 %vm1356_vm8, %v1764_v12  ;;  %3334 = vmatmul.msk.bf16.vlgmr.msrb.gmra.mxu3 %vm1356_vm8, %v1798_v27 }
 0x530   : > { %v1597_v26 = vpop.f32.mrf.mxu0 }
 0x531   : > { %v1685_v37 = vpack.c.bf16 %v1597_v26, %v1597_v26 }
 0x533   : > { %v1695_v48 = vunpack.c.l.b16 %v1685_v37 }
 0x535   : > { %v1696_v49 = vpack.c.b16 %v1695_v48, %v1694_v47 }
 0x537   : > { %3307 = vmatmul.msk.bf16.vlgmr.msra.gmra.mxu0 %vm1356_vm8, %v1696_v49 }
 0x538   : > { %2163 = vmatpush.bf16.msra.mxu0 %v2151_v52 }
 0x53d   : > { %3337 = vmatmul.msk.bf16.vlgmr.msrb.gmra.mxu2 %vm1356_vm8, %v1982_v16  ;;  %3338 = vmatmul.msk.bf16.vlgmr.msra.gmra.mxu3 %vm1356_vm8, %v2012_v53 }
 0x547   : > { %v1623_v31 = vpop.f32.mrf.mxu1  ;;  %3335 = vmatmul.msk.bf16.vlgmr.msrb.gmra.mxu0 %vm1356_vm8, %v1922_v11  ;;  %v1952_v11 = vpack.c.b16 %v1951_v6, %v1950_v50 }
 0x548   : > { %2276 = vmatpush.bf16.msrb.mxu0 %v4290_v2  ;;  %v1686_v56 = vpack.c.bf16 %v1623_v31, %v1623_v31 }
 0x54a   : > { %v1728_v63 = vunpack.c.l.b16 %v1686_v56 }
 0x54c   : > { %2277 = vmatpush.bf16.msrb.mxu0 %v4294_v36 }
 0x54f   : > { %v1625_v57 = vpop.f32.mrf.mxu1 }
 0x550   : > { %v1687_v60 = vpack.c.bf16 %v1625_v57, %v1625_v57 }
 0x552   : > { %v1729_v5 = vunpack.c.l.b16 %v1687_v60 }
 0x554   : > { %v1730_v0 = vpack.c.b16 %v1729_v5, %v1728_v63 }
 0x556   : > { %3316 = vmatmul.msk.bf16.vlgmr.msra.gmra.mxu1 %vm1356_vm8, %v1730_v0 }
 0x566   : > { %3336 = vmatmul.msk.bf16.vlgmr.msrb.gmra.mxu1 %vm1356_vm8, %v1952_v11 }
 0x5b0   : > { %v1789_v2 = vpop.f32.mrf.mxu2  ;;  %v1823_v36 = vpop.f32.mrf.mxu3 }
 0x5b4   : > { %v1721_v10 = vpop.f32.mrf.mxu0 }
 0x5b8   : > { %v1791_v41 = vpop.f32.mrf.mxu2  ;;  %v1825_v13 = vpop.f32.mrf.mxu3 }
 0x5bc   : > { %v1723_v15 = vpop.f32.mrf.mxu0 }
 0x5c0   : > { %v2003_v17 = vpop.f32.mrf.mxu2  ;;  %v2033_v18 = vpop.f32.mrf.mxu3 }
 0x5c1   : > { %v4380_v20 = vmul.f32 0.17677669, %v2003_v17  ;;  %v2044_v21 = vmul.f32 0.17677669, %v2033_v18 }
 0x5c3   : > { %v2058_v22 = vsel %vm1475_vm9, %v4380_v20, -inf  ;;  %v2064_v45 = vsel %vm1475_vm9, %v2044_v21, -inf }
 0x5c4   : > { %2059 = vmax.xlane.f32.xlu0 %v2058_v22  ;;  %v1943_v23 = vpop.f32.mrf.mxu0  ;;  %2065 = vmax.xlane.f32.xlu2 %v2064_v45 }
 0x5c5   : > { %v2038_v12 = vmul.f32 0.17677669, %v1943_v23 }
 0x5c7   : > { %v2046_v32 = vsel %vm1475_vm9, %v2038_v12, -inf }
 0x5c8   : > { %v2005_v27 = vpop.f32.mrf.mxu2  ;;  %v2035_v30 = vpop.f32.mrf.mxu3 }
 0x5c9   : > { %v2043_v28 = vmul.f32 0.17677669, %v2005_v27  ;;  %v2045_v58 = vmul.f32 0.17677669, %v2035_v30 }
 0x5cb   : > { %v2061_v33 = vsel %vm1475_vm9, %v2043_v28, -inf  ;;  %v2067_v29 = vsel %vm1475_vm9, %v2045_v58, -inf }
 0x5cc   : > { %2047 = vmax.xlane.f32.xlu0 %v2046_v32  ;;  %2062 = vmax.xlane.f32.xlu1 %v2061_v33  ;;  %v1945_v25 = vpop.f32.mrf.mxu0 }
 0x5cd   : > { %v2039_v9 = vmul.f32 0.17677669, %v1945_v25 }
 0x5cf   : > { %v2049_v59 = vsel %vm1475_vm9, %v2039_v9, -inf }
 0x5d3   : > { %v1755_v8 = vpop.f32.mrf.mxu1 }
 0x5d4   : > { %v1828_v61 = vadd.f32 %v1755_v8, %v1721_v10  ;;  %2050 = vmax.xlane.f32.xlu0 %v2049_v59 }
 0x5d6   : > { %v1829_v26 = vadd.f32 %v1828_v61, %v1789_v2 }
 0x5d8   : > { %v4388_v37 = vadd.f32 %v1829_v26, %v1823_v36 }
 0x5db   : > { %v1757_v38 = vpop.f32.mrf.mxu1 }
 0x5dc   : > { %v1831_v62 = vadd.f32 %v1757_v38, %v1723_v15  ;;  %3668 = vrot.lane.b32.xlu2 %v4325_v19, %s3841_s21 }
 0x5de   : > { %v1832_v40 = vadd.f32 %v1831_v62, %v1791_v41 }
 0x5e0   : > { %v4392_v44 = vadd.f32 %v1832_v40, %v1825_v13 }
 0x5e3   : > { %v1973_v24 = vpop.f32.mrf.mxu1 }
 0x5e4   : > { %v4394_v47 = vmul.f32 0.17677669, %v1973_v24  ;;  %v4443_v24 = vld [vmem:[%s4671_s0] ss:$0 sm:$0xff] }
 0x5e5   : > { %v2360_v30 = vadd.f32 %v4443_v24, %v4388_v37 }
 0x5e6   : > { %v2052_v48 = vsel %vm1475_vm9, %v4394_v47, -inf }
 0x5e7   : > { %2053 = vmax.xlane.f32.xlu0 %v2052_v48 }
 0x5eb   : > { %v1975_v39 = vpop.f32.mrf.mxu1 }
 0x5ec   : > { %v2041_v49 = vmul.f32 0.17677669, %v1975_v39 }
 0x5ee   : > { %v2055_v52 = vsel %vm1475_vm9, %v2041_v49, -inf }
 0x5ef   : > { %2056 = vmax.xlane.f32.xlu0 %v2055_v52 }
 0x5f7   : > { %2068 = vmax.xlane.f32.xlu0 %v2067_v29 }
 0x60b   : > { %3673 = vrot.lane.b32.xlu0 %v4325_v19, %s3843_s22 }
 0x637   : > { %v2060_v51 = vpop.xlane.xlu0 %2059  ;;  %v2066_v16 = vpop.xlane.xlu2 %2065 }
 0x638   : > { %v2076_v53 = vsub.f32 %v2044_v21, %v2066_v16  ;;  %v2074_v15 = vsub.f32 %v4380_v20, %v2060_v51  ;;  %v3786_v16 = vld [vmem:[#allocation2 + $0x10] sm:$0xff] }
 0x63a   : > { %v2090_v31 = vmul.f32 1.442695, %v2076_v53  ;;  %v2086_v45 = vmul.f32 1.442695, %v2074_v15  ;;  %v4449_v53 = vadd.f32 %v3786_v16, %v2360_v30 }
 0x63c   : > { %3730 = vpow2.f32 %v2090_v31  ;;  %v2361_v31 = vadd.f32 %v4443_v24, %v4392_v44 }
 0x63f   : > { %v2048_v56 = vpop.xlane.xlu0 %2047  ;;  %v2063_v57 = vpop.xlane.xlu1 %2062 }
 0x640   : > { %v2070_v60 = vsub.f32 %v2038_v12, %v2048_v56  ;;  %v2075_v63 = vsub.f32 %v2043_v28, %v2063_v57  ;;  %v3669_v5 = vpop.permute.xlu2 %3668  ;;  %v3787_v56 = vld [vmem:[#allocation2] sm:$0xff] }
 0x641   : > { %v3671_v0 = vunpack.i.h.bf16 %v3669_v5  ;;  %v3670_v1 = vunpack.i.l.bf16 %v3669_v5  ;;  %v4456_v57 = vadd.f32 %v3787_v56, %v2361_v31 }
 0x642   : > { %v2078_v3 = vmul.f32 1.442695, %v2070_v60  ;;  %v2088_v4 = vmul.f32 1.442695, %v2075_v63  ;;  %v4402_v7 = vpop.eup %3730 }
 0x643   : > { %v1915_v42 = vpack.c.bf16 %v3671_v0, %v3671_v0  ;;  %v1914_v6 = vpack.c.bf16 %v3670_v1, %v3670_v1  ;;  %v2112_v50 = vsel %vm1475_vm9, %v4402_v7, 0.0 }
 0x644   : > { %3732 = vpow2.f32 %v2078_v3  ;;  %2113 = vadd.xlane.f32.xlu0 %v2112_v50 }
 0x645   : > { %3734 = vpow2.f32 %v2088_v4  ;;  %v2206_v11 = vunpack.c.l.b16 %v1915_v42  ;;  %v2205_v2 = vunpack.c.l.b16 %v1914_v6 }
 0x647   : > { %v2207_v36 = vpack.c.b16 %v2206_v11, %v2205_v2  ;;  %v2051_v10 = vpop.xlane.xlu0 %2050 }
 0x648   : > { %v2071_v41 = vsub.f32 %v2039_v9, %v2051_v10 }
 0x649   : > { %2219 = vmatpush.bf16.msra.mxu2 %v2207_v36 }
 0x64a   : > { %v4406_v13 = vpop.eup %3732  ;;  %v2080_v17 = vmul.f32 1.442695, %v2071_v41 }
 0x64b   : > { %v4410_v18 = vpop.eup %3734  ;;  %v2094_v21 = vsel %vm1475_vm9, %v4406_v13, 0.0 }
 0x64c   : > { %3736 = vpow2.f32 %v2080_v17  ;;  %2095 = vadd.xlane.f32.xlu1 %v2094_v21  ;;  %v2109_v22 = vsel %vm1475_vm9, %v4410_v18, 0.0 }
 0x64d   : > { %2320 = vmatpush.bf16.msrb.mxu2 %v4345_v54  ;;  %2110 = vadd.xlane.f32.xlu2 %v2109_v22  ;;  %3738 = vpow2.f32 %v2086_v45 }
 0x651   : > { %2321 = vmatpush.bf16.msrb.mxu2 %v4349_v35 }
 0x652   : > { %v4417_v23 = vpop.eup %3736 }
 0x653   : > { %v2097_v54 = vsel %vm1475_vm9, %v4417_v23, 0.0  ;;  %v4421_v20 = vpop.eup %3738 }
 0x654   : > { %2098 = vadd.xlane.f32.xlu1 %v2097_v54  ;;  %v2106_v27 = vsel %vm1475_vm9, %v4421_v20, 0.0 }
 0x65a   : > { %v2054_v12 = vpop.xlane.xlu0 %2053 }
 0x65b   : > { %v2072_v8 = vsub.f32 %v4394_v47, %v2054_v12 }
 0x65c   : > { %2107 = vadd.xlane.f32.xlu1 %v2106_v27 }
 0x65d   : > { %v2082_v26 = vmul.f32 1.442695, %v2072_v8 }
 0x662   : > { %v2057_v28 = vpop.xlane.xlu0 %2056 }
 0x663   : > { %v2073_v32 = vsub.f32 %v2041_v49, %v2057_v28 }
 0x665   : > { %v2084_v33 = vmul.f32 1.442695, %v2073_v32  ;;  %3678 = vrot.lane.b32.xlu2 %v4325_v19, %s3842_s2 }
 0x667   : > { %3740 = vpow2.f32 %v2084_v33 }
 0x66a   : > { %v2069_v35 = vpop.xlane.xlu0 %2068 }
 0x66b   : > { %v2077_v25 = vsub.f32 %v2045_v58, %v2069_v35 }
 0x66d   : > { %v4427_v9 = vpop.eup %3740  ;;  %v2092_v59 = vmul.f32 1.442695, %v2077_v25 }
 0x66e   : > { %v2103_v61 = vsel %vm1475_vm9, %v4427_v9, 0.0 }
 0x66f   : > { %3742 = vpow2.f32 %v2092_v59  ;;  %2104 = vadd.xlane.f32.xlu0 %v2103_v61 }
 0x670   : > { %3744 = vpow2.f32 %v2082_v26 }
 0x675   : > { %v4432_v38 = vpop.eup %3742 }
 0x676   : > { %v2115_v19 = vsel %vm1475_vm9, %v4432_v38, 0.0  ;;  %v4436_v62 = vpop.eup %3744 }
 0x677   : > { %2116 = vadd.xlane.f32.xlu1 %v2115_v19  ;;  %v2100_v39 = vsel %vm1475_vm9, %v4436_v62, 0.0 }
 0x67d   : > { %v3674_v40 = vpop.permute.xlu0 %3673 }
 0x67e   : > { %v3676_v47 = vunpack.i.h.bf16 %v3674_v40  ;;  %v3675_v48 = vunpack.i.l.bf16 %v3674_v40 }
 0x67f   : > { %2101 = vadd.xlane.f32.xlu1 %v2100_v39 }
 0x680   : > { %v1917_v49 = vpack.c.bf16 %v3676_v47, %v3676_v47  ;;  %v1916_v52 = vpack.c.bf16 %v3675_v48, %v3675_v48 }
 0x682   : > { %v2234_v58 = vunpack.c.l.b16 %v1917_v49  ;;  %v2233_v29 = vunpack.c.l.b16 %v1916_v52 }
 0x684   : > { %v2235_v51 = vpack.c.b16 %v2234_v58, %v2233_v29 }
 0x686   : > { %2247 = vmatpush.bf16.msrb.mxu3 %v2235_v51 }
 0x687   : > { %2370 = vadd.xlane.f32.xlu1 %v4449_v53 }
 0x68a   : > { %2342 = vmatpush.bf16.msra.mxu3 %v4337_v34 }
 0x68e   : > { %2343 = vmatpush.bf16.msra.mxu3 %v4341_v14  ;;  %2372 = vadd.xlane.f32.xlu2 %v4456_v57 }
 0x6bf   : > { %v2096_v37 = vpop.xlane.xlu1 %2095 }
 0x6c0   : > { %v2111_v60 = vpop.xlane.xlu2 %2110  ;;  %3746 = vrcp.f32 %v2096_v37 }
 0x6c6   : > { %v3747_v5 = vpop.eup %3746 }
 0x6c7   : > { %v2099_v63 = vpop.xlane.xlu1 %2098  ;;  %v2126_v34 = vmul.f32 %v3747_v5, %v4406_v13 }
 0x6c8   : > { %3748 = vrcp.f32 %v2099_v63  ;;  %v3679_v0 = vpop.permute.xlu2 %3678 }
 0x6c9   : > { %v3681_v1 = vunpack.i.h.bf16 %v3679_v0  ;;  %v3680_v3 = vunpack.i.l.bf16 %v3679_v0  ;;  %3750 = vrcp.f32 %v2111_v60  ;;  %v2134_v50 = vpack.c.bf16 %v2126_v34, %v2126_v34 }
 0x6cb   : > { %v1913_v44 = vpack.c.bf16 %v3681_v1, %v3681_v1  ;;  %v1912_v4 = vpack.c.bf16 %v3680_v3, %v3680_v3  ;;  %v2144_v15 = vunpack.c.l.b16 %v2134_v50 }
 0x6cd   : > { %v2178_v14 = vunpack.c.l.b16 %v1913_v44  ;;  %v2177_v42 = vunpack.c.l.b16 %v1912_v4 }
 0x6ce   : > { %v3749_v6 = vpop.eup %3748 }
 0x6cf   : > { %v2127_v11 = vmul.f32 %v3749_v6, %v4417_v23  ;;  %v2179_v2 = vpack.c.b16 %v2178_v14, %v2177_v42  ;;  %v2108_v36 = vpop.xlane.xlu1 %2107  ;;  %v3751_v10 = vpop.eup %3750 }
 0x6d0   : > { %3752 = vrcp.f32 %v2108_v36  ;;  %v2131_v17 = vmul.f32 %v3751_v10, %v4410_v18 }
 0x6d1   : > { %v2135_v41 = vpack.c.bf16 %v2127_v11, %v2127_v11  ;;  %2191 = vmatpush.bf16.msra.mxu1 %v2179_v2 }
 0x6d2   : > { %v2139_v45 = vpack.c.bf16 %v2131_v17, %v2131_v17 }
 0x6d3   : > { %v2145_v13 = vunpack.c.l.b16 %v2135_v41 }
 0x6d4   : > { %v2201_v12 = vunpack.c.l.b16 %v2139_v45 }
 0x6d5   : > { %2298 = vmatpush.bf16.msrb.mxu1 %v4353_v43  ;;  %v2146_v21 = vpack.c.b16 %v2145_v13, %v2144_v15  ;;  %v2114_v43 = vpop.xlane.xlu0 %2113 }
 0x6d6   : > { %v3753_v22 = vpop.eup %3752  ;;  %3754 = vrcp.f32 %v2114_v43 }
 0x6d7   : > { %v2130_v54 = vmul.f32 %v3753_v22, %v4421_v20  ;;  %3339 = vmatmul.msk.bf16.vlgmr.msra.gmra.mxu0 %vm1475_vm9, %v2146_v21 }
 0x6d9   : > { %2299 = vmatpush.bf16.msrb.mxu1 %v4358_v46  ;;  %v2138_v23 = vpack.c.bf16 %v2130_v54, %v2130_v54 }
 0x6db   : > { %v2200_v27 = vunpack.c.l.b16 %v2138_v23 }
 0x6dc   : > { %v3755_v33 = vpop.eup %3754 }
 0x6dd   : > { %v2202_v28 = vpack.c.b16 %v2201_v12, %v2200_v27  ;;  %v2132_v46 = vmul.f32 %v3755_v33, %v4402_v7 }
 0x6df   : > { %3341 = vmatmul.msk.bf16.vlgmr.msra.gmra.mxu2 %vm1475_vm9, %v2202_v28  ;;  %v2140_v25 = vpack.c.bf16 %v2132_v46, %v2132_v46 }
 0x6e1   : > { %v2228_v26 = vunpack.c.l.b16 %v2140_v25 }
 0x6e2   : > { %v2105_v32 = vpop.xlane.xlu0 %2104 }
 0x6ea   : > { %v2117_v18 = vpop.xlane.xlu1 %2116 }
 0x6eb   : > { %3756 = vrcp.f32 %v2117_v18 }
 0x6ec   : > { %3758 = vrcp.f32 %v2105_v32  ;;  %v3788_v32 = vld [vmem:[#allocation2 + $0x18] sm:$0xff] }
 0x6f1   : > { %v3757_v35 = vpop.eup %3756 }
 0x6f2   : > { %v2133_v20 = vmul.f32 %v3757_v35, %v4432_v38  ;;  %v2102_v8 = vpop.xlane.xlu1 %2101  ;;  %v3759_v59 = vpop.eup %3758 }
 0x6f3   : > { %3760 = vrcp.f32 %v2102_v8  ;;  %v2129_v19 = vmul.f32 %v3759_v59, %v4427_v9 }
 0x6f4   : > { %v2141_v61 = vpack.c.bf16 %v2133_v20, %v2133_v20 }
 0x6f5   : > { %v2137_v39 = vpack.c.bf16 %v2129_v19, %v2129_v19 }
 0x6f6   : > { %v2229_v40 = vunpack.c.l.b16 %v2141_v61  ;;  %v3789_v61 = vld [vmem:[#allocation2 + $0x8] sm:$0xff] }
 0x6f7   : > { %v2173_v52 = vunpack.c.l.b16 %v2137_v39 }
 0x6f8   : > { %v2230_v47 = vpack.c.b16 %v2229_v40, %v2228_v26 }
 0x6f9   : > { %v3761_v48 = vpop.eup %3760 }
 0x6fa   : > { %v2128_v49 = vmul.f32 %v3761_v48, %v4436_v62  ;;  %3342 = vmatmul.msk.bf16.vlgmr.msrb.gmra.mxu3 %vm1475_vm9, %v2230_v47  ;;  %v2371_v20 = vpop.xlane.xlu1 %2370 }
 0x6fb   : > { %v2378_v59 = vmul.f32 %v2371_v20, %v4087_v55  ;;  %v3359_v20 = vld [vmem:[%s3998_s6 + $0x18] sm:$0xf0] }
 0x6fc   : > { %v2136_v7 = vpack.c.bf16 %v2128_v49, %v2128_v49  ;;  %v3405_v49 = vld [vmem:[%s3998_s6 + $0x70] sm:$0xf] }
 0x6fd   : > { %v4487_v19 = vsub.f32 %v4449_v53, %v2378_v59  ;;  %v3529_v59 = vld [vmem:[%s3998_s6 + $0x4] sm:$0xf0] }
 0x6fe   : > { %v2172_v30 = vunpack.c.l.b16 %v2136_v7  ;;  %v3543_v7 = vld [vmem:[%s3998_s6 + $0x74] sm:$0xf0] }
 0x700   : > { %v2174_v58 = vpack.c.b16 %v2173_v52, %v2172_v30  ;;  %v3542_v52 = vld [vmem:[%s3998_s6 + $0x74] sm:$0xf]  ;;  %v3406_v30 = vor.u32 %v3543_v7, %v3405_v49 }
 0x701   : > { %v2373_v40 = vpop.xlane.xlu2 %2372 }
 0x702   : > { %3340 = vmatmul.msk.bf16.vlgmr.msra.gmra.mxu1 %vm1475_vm9, %v2174_v58  ;;  %v2379_v47 = vmul.f32 %v2373_v40, %v4087_v55  ;;  %v3407_v58 = vld [vmem:[%s3998_s6 + $0x78] sm:$0xf0]  ;;  %2568 = vmatpush.bf16.msra.mxu0 %v3406_v30 }
 0x704   : > { %v4493_v48 = vsub.f32 %v4456_v57, %v2379_v47  ;;  %v3528_v47 = vld [vmem:[%s3998_s6 + $0x4] sm:$0xf] }
 0x706   : > { %v2387_v39 = vmul.f32 %v4493_v48, %v4493_v48 }
 0x754   : > { %v2165_v38 = vpop.f32.mrf.mxu0 }
 0x755   : > { %v2254_v29 = vpack.c.bf16 %v2165_v38, %v2165_v38  ;;  %v3410_v38 = vor.u32 %v3542_v52, %v3407_v58 }
 0x757   : > { %v2264_v31 = vunpack.c.l.b16 %v2254_v29  ;;  %2587 = vmatpush.bf16.msra.mxu1 %v3410_v38  ;;  %v3397_v29 = vld [vmem:[%s3998_s6 + $0x60] sm:$0xf] }
 0x75c   : > { %v2167_v51 = vpop.f32.mrf.mxu0 }
 0x75d   : > { %v2255_v16 = vpack.c.bf16 %v2167_v51, %v2167_v51  ;;  %v3541_v51 = vld [vmem:[%s3998_s6 + $0x64] sm:$0xf0] }
 0x75f   : > { %v2265_v9 = vunpack.c.l.b16 %v2255_v16  ;;  %v3540_v16 = vld [vmem:[%s3998_s6 + $0x64] sm:$0xf] }
 0x761   : > { %v2266_v56 = vpack.c.b16 %v2265_v9, %v2264_v31  ;;  %v3398_v31 = vor.u32 %v3541_v51, %v3397_v29  ;;  %v3399_v9 = vld [vmem:[%s3998_s6 + $0x68] sm:$0xf0] }
 0x762   : > { %v2221_v37 = vpop.f32.mrf.mxu2 }
 0x763   : > { %3343 = vmatmul.msk.bf16.vlgmr.msrb.gmra.mxu0 %vm1356_vm8, %v2266_v56  ;;  %v2258_v60 = vpack.c.bf16 %v2221_v37, %v2221_v37  ;;  %v3402_v56 = vor.u32 %v3540_v16, %v3399_v9  ;;  %v3389_v37 = vld [vmem:[%s3998_s6 + $0x50] sm:$0xf] }
 0x764   : > { %2569 = vmatpush.bf16.msra.mxu0 %v3398_v31 }
 0x765   : > { %v2308_v5 = vunpack.c.l.b16 %v2258_v60  ;;  %2588 = vmatpush.bf16.msra.mxu1 %v3402_v56  ;;  %v3539_v60 = vld [vmem:[%s3998_s6 + $0x54] sm:$0xf0] }
 0x76a   : > { %v2223_v62 = vpop.f32.mrf.mxu2 }
 0x76b   : > { %v2259_v63 = vpack.c.bf16 %v2223_v62, %v2223_v62  ;;  %v3538_v62 = vld [vmem:[%s3998_s6 + $0x54] sm:$0xf] }
 0x76d   : > { %v2309_v0 = vunpack.c.l.b16 %v2259_v63 }
 0x76f   : > { %v2310_v1 = vpack.c.b16 %v2309_v0, %v2308_v5  ;;  %v3390_v5 = vor.u32 %v3539_v60, %v3389_v37  ;;  %v3391_v0 = vld [vmem:[%s3998_s6 + $0x58] sm:$0xf0] }
 0x771   : > { %3345 = vmatmul.msk.bf16.vlgmr.msrb.gmra.mxu2 %vm1356_vm8, %v2310_v1  ;;  %2570 = vmatpush.bf16.msra.mxu0 %v3390_v5 }
 0x77d   : > { %v2249_v3 = vpop.f32.mrf.mxu3 }
 0x77e   : > { %v2260_v44 = vpack.c.bf16 %v2249_v3, %v2249_v3  ;;  %v3394_v3 = vor.u32 %v3538_v62, %v3391_v0 }
 0x77f   : > { %v2193_v34 = vpop.f32.mrf.mxu1 }
 0x780   : > { %v2256_v14 = vpack.c.bf16 %v2193_v34, %v2193_v34  ;;  %v2330_v50 = vunpack.c.l.b16 %v2260_v44  ;;  %2589 = vmatpush.bf16.msra.mxu1 %v3394_v3  ;;  %v3381_v44 = vld [vmem:[%s3998_s6 + $0x40] sm:$0xf] }
 0x782   : > { %v2286_v36 = vunpack.c.l.b16 %v2256_v14  ;;  %v3536_v14 = vld [vmem:[%s3998_s6 + $0x44] sm:$0xf] }
 0x785   : > { %v2251_v4 = vpop.f32.mrf.mxu3 }
 0x786   : > { %v2261_v42 = vpack.c.bf16 %v2251_v4, %v2251_v4  ;;  %v3537_v4 = vld [vmem:[%s3998_s6 + $0x44] sm:$0xf0] }
 0x787   : > { %v2195_v6 = vpop.f32.mrf.mxu1 }
 0x788   : > { %v2331_v11 = vunpack.c.l.b16 %v2261_v42  ;;  %v2257_v2 = vpack.c.bf16 %v2195_v6, %v2195_v6  ;;  %v3382_v42 = vor.u32 %v3537_v4, %v3381_v44  ;;  %v3383_v6 = vld [vmem:[%s3998_s6 + $0x48] sm:$0xf0] }
 0x78a   : > { %v2332_v10 = vpack.c.b16 %v2331_v11, %v2330_v50  ;;  %v2287_v41 = vunpack.c.l.b16 %v2257_v2  ;;  %v3386_v11 = vor.u32 %v3536_v14, %v3383_v6  ;;  %2571 = vmatpush.bf16.msra.mxu0 %v3382_v42  ;;  %v3373_v2 = vld [vmem:[%s3998_s6 + $0x30] sm:$0xf]  ;;  %v3686_v42 = vld [vmem:[%s4673_s19] ss:$0 sm:$0xff] }
 0x78c   : > { %v2288_v15 = vpack.c.b16 %v2287_v41, %v2286_v36  ;;  %3346 = vmatmul.msk.bf16.vlgmr.msra.gmra.mxu3 %vm1356_vm8, %v2332_v10  ;;  %2590 = vmatpush.bf16.msra.mxu1 %v3386_v11  ;;  %v3535_v36 = vld [vmem:[%s3998_s6 + $0x34] sm:$0xf0]  ;;  %v3534_v10 = vld [vmem:[%s3998_s6 + $0x34] sm:$0xf] }
 0x78e   : > { %3344 = vmatmul.msk.bf16.vlgmr.msrb.gmra.mxu1 %vm1356_vm8, %v2288_v15  ;;  %v3374_v15 = vor.u32 %v3535_v36, %v3373_v2 }
 0x790   : > { %2572 = vmatpush.bf16.msra.mxu0 %v3374_v15 }
 0x7e0   : > { %v2279_v17 = vpop.f32.mrf.mxu0 }
 0x7e8   : > { %v2281_v27 = vpop.f32.mrf.mxu0 }
 0x7f4   : > { %v2323_v13 = vpop.f32.mrf.mxu2 }
 0x7fc   : > { %v2325_v33 = vpop.f32.mrf.mxu2 }
 0x80b   : > { %v2301_v21 = vpop.f32.mrf.mxu1 }
 0x80c   : > { %v2350_v22 = vadd.f32 %v2301_v21, %v2279_v17  ;;  %v3375_v17 = vld [vmem:[%s3998_s6 + $0x38] sm:$0xf0] }
 0x80d   : > { %v3378_v21 = vor.u32 %v3534_v10, %v3375_v17 }
 0x80e   : > { %v2351_v45 = vadd.f32 %v2350_v22, %v2323_v13 }
 0x80f   : > { %v2345_v54 = vpop.f32.mrf.mxu3  ;;  %2591 = vmatpush.bf16.msra.mxu1 %v3378_v21 }
 0x810   : > { %v2352_v23 = vadd.f32 %v2351_v45, %v2345_v54  ;;  %v3365_v45 = vld [vmem:[%s3998_s6 + $0x20] sm:$0xf]  ;;  %v3533_v54 = vld [vmem:[%s3998_s6 + $0x24] sm:$0xf0] }
 0x812   : > { %v2362_v12 = vadd.f32 %v4443_v24, %v2352_v23  ;;  %v3532_v23 = vld [vmem:[%s3998_s6 + $0x24] sm:$0xf] }
 0x813   : > { %v2303_v28 = vpop.f32.mrf.mxu1 }
 0x814   : > { %v2353_v43 = vadd.f32 %v2303_v28, %v2281_v27  ;;  %v4478_v18 = vadd.f32 %v3788_v32, %v2362_v12  ;;  %v3366_v12 = vor.u32 %v3533_v54, %v3365_v45  ;;  %v3367_v27 = vld [vmem:[%s3998_s6 + $0x28] sm:$0xf0]  ;;  %v3357_v32 = vld [vmem:[%s3998_s6 + $0x10] sm:$0xf] }
 0x816   : > { %2374 = vadd.xlane.f32.xlu1 %v4478_v18  ;;  %v2354_v46 = vadd.f32 %v2353_v43, %v2325_v33  ;;  %v3370_v43 = vor.u32 %v3532_v23, %v3367_v27  ;;  %2573 = vmatpush.bf16.msra.mxu0 %v3366_v12  ;;  %v3531_v33 = vld [vmem:[%s3998_s6 + $0x14] sm:$0xf0] }
 0x817   : > { %v2347_v35 = vpop.f32.mrf.mxu3 }
 0x818   : > { %v2355_v25 = vadd.f32 %v2354_v46, %v2347_v35  ;;  %2592 = vmatpush.bf16.msra.mxu1 %v3370_v43  ;;  %v3530_v46 = vld [vmem:[%s3998_s6 + $0x14] sm:$0xf] }
 0x819   : > { %v3362_v40 = vor.u32 %v3530_v46, %v3359_v20  ;;  %v3559_v20 = vld [vmem:[%s4009_s5 + $0x78] sm:$0xff] }
 0x81a   : > { %v2363_v8 = vadd.f32 %v4443_v24, %v2355_v25  ;;  %v2386_v24 = vmul.f32 %v4487_v19, %v4487_v19  ;;  %v3358_v25 = vor.u32 %v3531_v33, %v3357_v32  ;;  %2833 = vmatpush.bf16.msrb.mxu3 %v3559_v20 }
 0x81c   : > { %v4483_v26 = vadd.f32 %v3789_v61, %v2363_v8  ;;  %v3349_v8 = vld [vmem:[%s3998_s6] sm:$0xf]  ;;  %2574 = vmatpush.bf16.msra.mxu0 %v3358_v25  ;;  %2593 = vmatpush.bf16.msra.mxu1 %v3362_v40  ;;  %v3551_v25 = vld [vmem:[%s4009_s5 + $0x38] sm:$0xff] }
 0x81d   : > { %2814 = vmatpush.bf16.msra.mxu2 %v3551_v25 }
 0x81e   : > { %2376 = vadd.xlane.f32.xlu1 %v4483_v26 }
 0x826   : > { %2390 = vadd.xlane.f32.xlu1 %v2386_v24  ;;  %v3351_v24 = vld [vmem:[%s3998_s6 + $0x8] sm:$0xf0] }
 0x827   : > { %v3354_v7 = vor.u32 %v3528_v47, %v3351_v24  ;;  %v3550_v47 = vld [vmem:[%s4009_s5 + $0x30] sm:$0xff] }
 0x828   : > { %v3558_v24 = vld [vmem:[%s4009_s5 + $0x70] sm:$0xff]  ;;  %2815 = vmatpush.bf16.msra.mxu2 %v3550_v47 }
 0x829   : > { %2594 = vmatpush.bf16.msra.mxu1 %v3354_v7  ;;  %2834 = vmatpush.bf16.msrb.mxu3 %v3558_v24  ;;  %v3549_v7 = vld [vmem:[%s4009_s5 + $0x28] sm:$0xff] }
 0x82c   : > { %2816 = vmatpush.bf16.msra.mxu2 %v3549_v7 }
 0x82e   : > { %2392 = vadd.xlane.f32.xlu1 %v2387_v39  ;;  %v3350_v39 = vor.u32 %v3529_v59, %v3349_v8 }
 0x830   : > { %2575 = vmatpush.bf16.msra.mxu0 %v3350_v39 }
 0x889   : > { %v2375_v63 = vpop.xlane.xlu1 %2374 }
 0x88a   : > { %v2380_v1 = vmul.f32 %v2375_v63, %v4087_v55 }
 0x88c   : > { %v4511_v34 = vsub.f32 %v4478_v18, %v2380_v1  ;;  %v3685_v1 = vld [vmem:[%s4672_s27] ss:$0 sm:$0xff] }
 0x88e   : > { %v2388_v50 = vmul.f32 %v4511_v34, %v4511_v34 }
 0x890   : > { %2394 = vadd.xlane.f32.xlu0 %v2388_v50 }
 0x891   : > { %v2377_v41 = vpop.xlane.xlu1 %2376 }
 0x892   : > { %v2381_v13 = vmul.f32 %v2377_v41, %v4087_v55 }
 0x894   : > { %v4525_v22 = vsub.f32 %v4483_v26, %v2381_v13 }
 0x896   : > { %v2389_v28 = vmul.f32 %v4525_v22, %v4525_v22 }
 0x898   : > { %2396 = vadd.xlane.f32.xlu1 %v2389_v28 }
 0x899   : > { %v2391_v35 = vpop.xlane.xlu1 %2390 }
 0x89a   : > { %v2398_v61 = vmul.f32 %v2391_v35, %v4087_v55 }
 0x89c   : > { %v2402_v49 = vadd.f32 1e-06, %v2398_v61 }
 0x89e   : > { %3762 = vrsqrt.f32 %v2402_v49  ;;  %vm2412_vm1 = vweird.f32 %v2402_v49 }
 0x8a1   : > { %v2393_v52 = vpop.xlane.xlu1 %2392 }
 0x8a2   : > { %v2399_v30 = vmul.f32 %v2393_v52, %v4087_v55  ;;  %v3548_v52 = vld [vmem:[%s4009_s5 + $0x20] sm:$0xff] }
 0x8a3   : > { %2817 = vmatpush.bf16.msra.mxu2 %v3548_v52 }
 0x8a4   : > { %v3763_v58 = vpop.eup %3762  ;;  %v2403_v38 = vadd.f32 1e-06, %v2399_v30  ;;  %v3556_v30 = vld [vmem:[%s4009_s5 + $0x60] sm:$0xff] }
 0x8a5   : > { %v2407_v29 = vmul.f32 %v3763_v58, %v2402_v49  ;;  %vm2413_vm0 = vweird.f32 %v3763_v58 }
 0x8a6   : > { %3764 = vrsqrt.f32 %v2403_v38  ;;  %vm2414_vm2 = vmor %vm2412_vm1, %vm2413_vm0  ;;  %vm2422_vm4 = vweird.f32 %v2403_v38 }
 0x8a7   : > { %v2408_v51 = vmul.f32 %v3763_v58, %v2407_v29  ;;  %v3546_v29 = vld [vmem:[%s4009_s5 + $0x10] sm:$0xff] }
 0x8a9   : > { %v2409_v16 = vmul.f32 0.5, %v2408_v51  ;;  %v3554_v51 = vld [vmem:[%s4009_s5 + $0x50] sm:$0xff] }
 0x8ab   : > { %v2410_v31 = vsub.f32 1.5, %v2409_v16  ;;  %v2482_v16 = vld [vmem:[%s4004_s23] sm:$0x3] }
 0x8ac   : > { %v3765_v9 = vpop.eup %3764 }
 0x8ad   : > { %v2411_v56 = vmul.f32 %v3763_v58, %v2410_v31  ;;  %v2417_v37 = vmul.f32 %v3765_v9, %v2403_v38  ;;  %vm2423_vm3 = vweird.f32 %v3765_v9  ;;  %v3555_v38 = vld [vmem:[%s4009_s5 + $0x58] sm:$0xff]  ;;  %v3545_v31 = vld [vmem:[%s4009_s5 + $0x8] sm:$0xff] }
 0x8ae   : > { %vm2424_vm5 = vmor %vm2422_vm4, %vm2423_vm3 }
 0x8af   : > { %v2418_v60 = vmul.f32 %v3765_v9, %v2417_v37  ;;  %v2415_v62 = vsel %vm2414_vm2, %v3763_v58, %v2411_v56  ;;  %v3547_v58 = vld [vmem:[%s4009_s5 + $0x18] sm:$0xff]  ;;  %v4574_v56 = vperm.slane %v2482_v16, 0  ;;  %v4576_v37 = vperm.slane %v2482_v16, 1 }
 0x8b0   : > { %v2446_v0 = vmul.f32 %v2415_v62, %v4487_v19  ;;  %2818 = vmatpush.bf16.msra.mxu2 %v3547_v58  ;;  %v3552_v62 = vld [vmem:[%s4009_s5 + $0x40] sm:$0xff] }
 0x8b1   : > { %v2419_v63 = vmul.f32 0.5, %v2418_v60  ;;  %v3544_v60 = vld [vmem:[%s4009_s5] sm:$0xff] }
 0x8b2   : > { %v2453_v14 = vmul.f32 %v3685_v1, %v2446_v0 }
 0x8b3   : > { %v2420_v5 = vsub.f32 1.5, %v2419_v63 }
 0x8b4   : > { %v2460_v50 = vadd.f32 %v3686_v42, %v2453_v14  ;;  %2819 = vmatpush.bf16.msra.mxu2 %v3546_v29 }
 0x8b5   : > { %v2421_v3 = vmul.f32 %v3765_v9, %v2420_v5 }
 0x8b7   : > { %v2425_v44 = vsel %vm2424_vm5, %v3765_v9, %v2421_v3  ;;  %v3553_v9 = vld [vmem:[%s4009_s5 + $0x48] sm:$0xff] }
 0x8b8   : > { %v2447_v4 = vmul.f32 %v2425_v44, %v4493_v48  ;;  %2820 = vmatpush.bf16.msra.mxu2 %v3545_v31 }
 0x8ba   : > { %v2454_v6 = vmul.f32 %v3685_v1, %v2447_v4 }
 0x8bc   : > { %v2461_v19 = vadd.f32 %v3686_v42, %v2454_v6  ;;  %2821 = vmatpush.bf16.msra.mxu2 %v3544_v60 }
 0x8be   : > { %v2464_v11 = vpack.c.bf16 %v2461_v19, %v2460_v50 }
 0x8c0   : > { %2576 = vmatmul.bf16.vlgmr.msra.gmra.mxu0 %v2464_v11  ;;  %2595 = vmatmul.bf16.vlgmr.msra.gmra.mxu1 %v2464_v11 }
 0x903   : > { %v2395_v2 = vpop.xlane.xlu0 %2394 }
 0x904   : > { %v2400_v36 = vmul.f32 %v2395_v2, %v4087_v55 }
 0x906   : > { %v2404_v10 = vadd.f32 1e-06, %v2400_v36 }
 0x908   : > { %3766 = vrsqrt.f32 %v2404_v10  ;;  %vm2432_vm7 = vweird.f32 %v2404_v10 }
 0x90b   : > { %v2397_v41 = vpop.xlane.xlu1 %2396 }
 0x90c   : > { %v2401_v48 = vmul.f32 %v2397_v41, %v4087_v55 }
 0x90e   : > { %v3767_v15 = vpop.eup %3766  ;;  %v2405_v17 = vadd.f32 1e-06, %v2401_v48 }
 0x90f   : > { %v2427_v13 = vmul.f32 %v3767_v15, %v2404_v10  ;;  %vm2433_vm6 = vweird.f32 %v3767_v15 }
 0x910   : > { %3768 = vrsqrt.f32 %v2405_v17  ;;  %vm2434_vm8 = vmor %vm2432_vm7, %vm2433_vm6  ;;  %vm2442_vm10 = vweird.f32 %v2405_v17 }
 0x911   : > { %v2428_v21 = vmul.f32 %v3767_v15, %v2427_v13 }
 0x913   : > { %v2429_v45 = vmul.f32 0.5, %v2428_v21 }
 0x915   : > { %v2430_v54 = vsub.f32 1.5, %v2429_v45 }
 0x916   : > { %v3769_v23 = vpop.eup %3768 }
 0x917   : > { %v2431_v12 = vmul.f32 %v3767_v15, %v2430_v54  ;;  %v2437_v27 = vmul.f32 %v3769_v23, %v2405_v17  ;;  %vm2443_vm9 = vweird.f32 %v3769_v23 }
 0x918   : > { %vm2444_vm11 = vmor %vm2442_vm10, %vm2443_vm9 }
 0x919   : > { %v2438_v28 = vmul.f32 %v3769_v23, %v2437_v27  ;;  %v2435_v32 = vsel %vm2434_vm8, %v3767_v15, %v2431_v12 }
 0x91a   : > { %v2448_v46 = vmul.f32 %v2435_v32, %v4511_v34 }
 0x91b   : > { %v2439_v43 = vmul.f32 0.5, %v2438_v28 }
 0x91c   : > { %v2455_v61 = vmul.f32 %v3685_v1, %v2448_v46 }
 0x91d   : > { %v2440_v33 = vsub.f32 1.5, %v2439_v43 }
 0x91e   : > { %v2462_v34 = vadd.f32 %v3686_v42, %v2455_v61 }
 0x91f   : > { %v2441_v35 = vmul.f32 %v3769_v23, %v2440_v33 }
 0x921   : > { %v2445_v8 = vsel %vm2444_vm11, %v3769_v23, %v2441_v35 }
 0x922   : > { %v2449_v59 = vmul.f32 %v2445_v8, %v4525_v22  ;;  %v3557_v22 = vld [vmem:[%s4009_s5 + $0x68] sm:$0xff] }
 0x923   : > { %2835 = vmatpush.bf16.msrb.mxu3 %v3557_v22 }
 0x924   : > { %v2456_v40 = vmul.f32 %v3685_v1, %v2449_v59 }
 0x926   : > { %v2463_v39 = vadd.f32 %v3686_v42, %v2456_v40 }
 0x927   : > { %2836 = vmatpush.bf16.msrb.mxu3 %v3556_v30 }
 0x928   : > { %v2465_v49 = vpack.c.bf16 %v2463_v39, %v2462_v34 }
 0x92a   : > { %2581 = vmatmul.bf16.gmra.mxu0 %v2465_v49  ;;  %2600 = vmatmul.bf16.gmra.mxu1 %v2465_v49 }
 0x92b   : > { %2837 = vmatpush.bf16.msrb.mxu3 %v3555_v38 }
 0x92f   : > { %2838 = vmatpush.bf16.msrb.mxu3 %v3554_v51 }
 0x933   : > { %2839 = vmatpush.bf16.msrb.mxu3 %v3553_v9 }
 0x937   : > { %2840 = vmatpush.bf16.msrb.mxu3 %v3552_v62 }
 0x93d   : > { %v2577_v63 = vpop.f32.mrf.mxu0  ;;  %v2596_v5 = vpop.f32.mrf.mxu1 }
 0x93e   : > { %v2578_v0 = vadd.f32 %v2577_v63, %v4574_v56  ;;  %v2597_v1 = vadd.f32 %v2596_v5, %v4576_v37 }
 0x940   : > { %v2614_v3 = vmul.f32 0.044715, %v2578_v0  ;;  %v2615_v44 = vmul.f32 0.044715, %v2597_v1  ;;  %v2606_v20 = vmul.f32 0.5, %v2578_v0  ;;  %v2607_v61 = vmul.f32 0.5, %v2597_v1 }
 0x942   : > { %v2622_v4 = vmul.f32 %v2614_v3, %v2578_v0  ;;  %v2623_v14 = vmul.f32 %v2615_v44, %v2597_v1 }
 0x944   : > { %v2630_v42 = vmul.f32 %v2622_v4, %v2578_v0  ;;  %v2631_v6 = vmul.f32 %v2623_v14, %v2597_v1 }
 0x945   : > { %v2579_v50 = vpop.f32.mrf.mxu0  ;;  %v2598_v19 = vpop.f32.mrf.mxu1 }
 0x946   : > { %v2638_v11 = vadd.f32 %v2630_v42, %v2578_v0  ;;  %v2580_v2 = vadd.f32 %v2579_v50, %v4574_v56  ;;  %v2599_v36 = vadd.f32 %v2598_v19, %v4576_v37  ;;  %v2639_v10 = vadd.f32 %v2631_v6, %v2597_v1 }
 0x948   : > { %v2616_v41 = vmul.f32 0.044715, %v2580_v2  ;;  %v2617_v48 = vmul.f32 0.044715, %v2599_v36  ;;  %v2646_v15 = vmul.f32 0.7978846, %v2638_v11 }
 0x949   : > { %v2647_v13 = vmul.f32 0.7978846, %v2639_v10  ;;  %v2608_v8 = vmul.f32 0.5, %v2580_v2  ;;  %v2609_v40 = vmul.f32 0.5, %v2599_v36 }
 0x94a   : > { %v2624_v17 = vmul.f32 %v2616_v41, %v2580_v2  ;;  %v2625_v21 = vmul.f32 %v2617_v48, %v2599_v36  ;;  %3770 = vtanh.f32 %v2646_v15 }
 0x94b   : > { %3772 = vtanh.f32 %v2647_v13 }
 0x94c   : > { %v2632_v45 = vmul.f32 %v2624_v17, %v2580_v2  ;;  %v2633_v54 = vmul.f32 %v2625_v21, %v2599_v36 }
 0x94e   : > { %v2640_v23 = vadd.f32 %v2632_v45, %v2580_v2  ;;  %v2641_v12 = vadd.f32 %v2633_v54, %v2599_v36 }
 0x950   : > { %v2648_v27 = vmul.f32 0.7978846, %v2640_v23  ;;  %v2649_v28 = vmul.f32 0.7978846, %v2641_v12  ;;  %v3771_v43 = vpop.eup %3770 }
 0x951   : > { %v3773_v32 = vpop.eup %3772  ;;  %v2662_v33 = vadd.f32 1.0, %v3771_v43 }
 0x952   : > { %3774 = vtanh.f32 %v2648_v27  ;;  %v2663_v35 = vadd.f32 1.0, %v3773_v32 }
 0x953   : > { %3776 = vtanh.f32 %v2649_v28  ;;  %v2670_v24 = vmul.f32 %v2662_v33, %v2606_v20 }
 0x954   : > { %v2671_v39 = vmul.f32 %v2663_v35, %v2607_v61 }
 0x958   : > { %v3775_v46 = vpop.eup %3774 }
 0x959   : > { %v3777_v25 = vpop.eup %3776  ;;  %v2664_v59 = vadd.f32 1.0, %v3775_v46 }
 0x95a   : > { %v2665_v47 = vadd.f32 1.0, %v3777_v25  ;;  %v3687_v25 = vld [vmem:[%s4674_s20] ss:$0 sm:$0xff] }
 0x95b   : > { %v2672_v34 = vmul.f32 %v2664_v59, %v2608_v8 }
 0x95c   : > { %v2673_v49 = vmul.f32 %v2665_v47, %v2609_v40 }
 0x95d   : > { %v2678_v7 = vpack.c.bf16 %v2672_v34, %v2670_v24 }
 0x95e   : > { %v2679_v22 = vpack.c.bf16 %v2673_v49, %v2671_v39 }
 0x95f   : > { %2822 = vmatmul.bf16.vlgmr.msra.gmra.mxu2 %v2678_v7 }
 0x960   : > { %2841 = vmatmul.bf16.vlgmr.msrb.gmra.mxu3 %v2679_v22 }
 0x9a7   : > { %v2582_v52 = vpop.f32.mrf.mxu0  ;;  %v2601_v30 = vpop.f32.mrf.mxu1 }
 0x9a8   : > { %v2583_v58 = vadd.f32 %v2582_v52, %v4574_v56  ;;  %v2602_v38 = vadd.f32 %v2601_v30, %v4576_v37 }
 0x9aa   : > { %v2618_v29 = vmul.f32 0.044715, %v2583_v58  ;;  %v2619_v51 = vmul.f32 0.044715, %v2602_v38  ;;  %v2610_v21 = vmul.f32 0.5, %v2583_v58  ;;  %v2611_v23 = vmul.f32 0.5, %v2602_v38 }
 0x9ac   : > { %v2626_v16 = vmul.f32 %v2618_v29, %v2583_v58  ;;  %v2627_v31 = vmul.f32 %v2619_v51, %v2602_v38 }
 0x9ae   : > { %v2634_v9 = vmul.f32 %v2626_v16, %v2583_v58  ;;  %v2635_v60 = vmul.f32 %v2627_v31, %v2602_v38 }
 0x9af   : > { %v2584_v62 = vpop.f32.mrf.mxu0  ;;  %v2603_v63 = vpop.f32.mrf.mxu1 }
 0x9b0   : > { %v2585_v5 = vadd.f32 %v2584_v62, %v4574_v56  ;;  %v2604_v0 = vadd.f32 %v2603_v63, %v4576_v37  ;;  %v2642_v1 = vadd.f32 %v2634_v9, %v2583_v58  ;;  %v2643_v3 = vadd.f32 %v2635_v60, %v2602_v38 }
 0x9b2   : > { %v2620_v44 = vmul.f32 0.044715, %v2585_v5  ;;  %v2621_v4 = vmul.f32 0.044715, %v2604_v0  ;;  %v2650_v42 = vmul.f32 0.7978846, %v2642_v1 }
 0x9b3   : > { %v2651_v50 = vmul.f32 0.7978846, %v2643_v3  ;;  %v2612_v45 = vmul.f32 0.5, %v2585_v5  ;;  %v2613_v12 = vmul.f32 0.5, %v2604_v0 }
 0x9b4   : > { %v2628_v14 = vmul.f32 %v2620_v44, %v2585_v5  ;;  %v2629_v6 = vmul.f32 %v2621_v4, %v2604_v0  ;;  %3778 = vtanh.f32 %v2650_v42 }
 0x9b5   : > { %3780 = vtanh.f32 %v2651_v50 }
 0x9b6   : > { %v2636_v19 = vmul.f32 %v2628_v14, %v2585_v5  ;;  %v2637_v11 = vmul.f32 %v2629_v6, %v2604_v0 }
 0x9b8   : > { %v2644_v2 = vadd.f32 %v2636_v19, %v2585_v5  ;;  %v2645_v36 = vadd.f32 %v2637_v11, %v2604_v0 }
 0x9ba   : > { %v2652_v10 = vmul.f32 0.7978846, %v2644_v2  ;;  %v2653_v41 = vmul.f32 0.7978846, %v2645_v36  ;;  %v3779_v56 = vpop.eup %3778 }
 0x9bb   : > { %v3781_v37 = vpop.eup %3780  ;;  %v2666_v48 = vadd.f32 1.0, %v3779_v56 }
 0x9bc   : > { %3782 = vtanh.f32 %v2652_v10  ;;  %v2667_v17 = vadd.f32 1.0, %v3781_v37 }
 0x9bd   : > { %3784 = vtanh.f32 %v2653_v41  ;;  %v2674_v28 = vmul.f32 %v2666_v48, %v2610_v21 }
 0x9be   : > { %v2675_v32 = vmul.f32 %v2667_v17, %v2611_v23 }
 0x9c2   : > { %v3783_v15 = vpop.eup %3782 }
 0x9c3   : > { %v3785_v13 = vpop.eup %3784  ;;  %v2668_v54 = vadd.f32 1.0, %v3783_v15 }
 0x9c4   : > { %v2669_v27 = vadd.f32 1.0, %v3785_v13 }
 0x9c5   : > { %v2676_v43 = vmul.f32 %v2668_v54, %v2612_v45 }
 0x9c6   : > { %v2677_v33 = vmul.f32 %v2669_v27, %v2613_v12 }
 0x9c7   : > { %v2680_v46 = vpack.c.bf16 %v2676_v43, %v2674_v28 }
 0x9c8   : > { %v2681_v35 = vpack.c.bf16 %v2677_v33, %v2675_v32 }
 0x9c9   : > { %2827 = vmatmul.bf16.gmra.mxu2 %v2680_v46 }
 0x9ca   : > { %2846 = vmatmul.bf16.gmra.mxu3 %v2681_v35 }
 0x9e2   : > { %v2823_v20 = vpop.f32.mrf.mxu2 }
 0x9e3   : > { %v2824_v8 = vadd.f32 %v3687_v25, %v2823_v20  ;;  %v2842_v59 = vpop.f32.mrf.mxu3 }
 0x9e5   : > { %v2843_v61 = vadd.f32 %v2842_v59, %v2824_v8 }
 0x9e7   : > { %v2852_v40 = vadd.f32 %v2843_v61, %v4449_v53 }
 0x9ea   : > { %v2825_v47 = vpop.f32.mrf.mxu2 }
 0x9eb   : > { %v2826_v24 = vadd.f32 %v3687_v25, %v2825_v47  ;;  %v2844_v34 = vpop.f32.mrf.mxu3 }
 0x9ed   : > { %v2845_v39 = vadd.f32 %v2844_v34, %v2826_v24 }
 0x9ef   : > { %v2853_v49 = vadd.f32 %v2845_v39, %v4456_v57 }
 0xa4c   : > { %v2828_v7 = vpop.f32.mrf.mxu2 }
 0xa4d   : > { %v2829_v22 = vadd.f32 %v3687_v25, %v2828_v7  ;;  %v2847_v52 = vpop.f32.mrf.mxu3 }
 0xa4f   : > { %v2848_v30 = vadd.f32 %v2847_v52, %v2829_v22 }
 0xa51   : > { %v2854_v58 = vadd.f32 %v2848_v30, %v4478_v18 }
 0xa54   : > { %v2830_v38 = vpop.f32.mrf.mxu2 }
 0xa55   : > { %v2831_v29 = vadd.f32 %v3687_v25, %v2830_v38  ;;  %v2849_v51 = vpop.f32.mrf.mxu3  ;;  %2859 = sbr.rel (%p3475_p5) target bundleno = 2654 (0xa5e), region = 100 }
 0xa57   : > { %v2850_v16 = vadd.f32 %v2849_v51, %v2831_v29 }
 0xa59   : > { %v2855_v31 = vadd.f32 %v2850_v16, %v4483_v26 }
 0xa5a   : > { %2860 = vst [vmem:[#allocation2 + $0x10] sm:$0xff] %v2852_v40 }
 0xa5b   : > { %2861 = vst [vmem:[#allocation2] sm:$0xff] %v2853_v49 }
 0xa5c   : > { %2862 = vst [vmem:[#allocation2 + $0x18] sm:$0xff] %v2854_v58 }
 0xa5d   : > { %2863 = vst [vmem:[#allocation2 + $0x8] sm:$0xff] %v2855_v31 }
 0xa5e PF: > { %p3476_p6 = scmp.ne.s32.totalorder %s3948_s28, 1 }
 0xa5f   : > { %s4675_s24 = sld [smem:[#allocation13_spill]] (!%p3476_p6) }
 0xa60   : > { %2867 = sbr.rel (%p3476_p6) target bundleno = 2937 (0xb79), region = 104  ;;  %s4676_s22 = sld [smem:[#allocation14_spill]] (!%p3476_p6) }
 0xa65   : > { %2874 = vadd.xlane.f32.xlu1 %v2854_v58  ;;  %2870 = vadd.xlane.f32.xlu0 %v2852_v40  ;;  %v3790_v35 = vld [vmem:[%s4675_s24] ss:$0 sm:$0xff] }
 0xa6d   : > { %2876 = vadd.xlane.f32.xlu1 %v2855_v31  ;;  %2872 = vadd.xlane.f32.xlu0 %v2853_v49 }
 0xad8   : > { %v2875_v53 = vpop.xlane.xlu1 %2874  ;;  %v2871_v57 = vpop.xlane.xlu0 %2870 }
 0xad9   : > { %v2880_v18 = vmul.f32 %v2875_v53, %v4087_v55  ;;  %v2878_v26 = vmul.f32 %v2871_v57, %v4087_v55 }
 0xadb   : > { %v2884_v9 = vsub.f32 %v2854_v58, %v2880_v18  ;;  %v2882_v60 = vsub.f32 %v2852_v40, %v2878_v26  ;;  %v3791_v40 = vld [vmem:[%s4676_s22] ss:$0 sm:$0xff] }
 0xadd   : > { %v2888_v62 = vmul.f32 %v2884_v9, %v2884_v9  ;;  %v2886_v63 = vmul.f32 %v2882_v60, %v2882_v60 }
 0xadf   : > { %2894 = vadd.xlane.f32.xlu0 %v2888_v62  ;;  %2890 = vadd.xlane.f32.xlu2 %v2886_v63 }
 0xae0   : > { %v2877_v5 = vpop.xlane.xlu1 %2876  ;;  %v2873_v0 = vpop.xlane.xlu0 %2872 }
 0xae1   : > { %v2881_v1 = vmul.f32 %v2877_v5, %v4087_v55  ;;  %v2879_v3 = vmul.f32 %v2873_v0, %v4087_v55 }
 0xae3   : > { %v4603_v44 = vsub.f32 %v2855_v31, %v2881_v1  ;;  %v4605_v4 = vsub.f32 %v2853_v49, %v2879_v3 }
 0xae5   : > { %v2889_v14 = vmul.f32 %v4603_v44, %v4603_v44  ;;  %v2887_v42 = vmul.f32 %v4605_v4, %v4605_v4 }
 0xae7   : > { %2896 = vadd.xlane.f32.xlu1 %v2889_v14  ;;  %2892 = vadd.xlane.f32.xlu2 %v2887_v42 }
 0xb52   : > { %v2891_v6 = vpop.xlane.xlu2 %2890  ;;  %v2895_v50 = vpop.xlane.xlu0 %2894 }
 0xb53   : > { %v2898_v19 = vmul.f32 %v2891_v6, %v4087_v55  ;;  %v2900_v11 = vmul.f32 %v2895_v50, %v4087_v55 }
 0xb55   : > { %v2902_v2 = vadd.f32 1e-06, %v2898_v19  ;;  %v2904_v36 = vadd.f32 1e-06, %v2900_v11 }
 0xb57   : > { %3792 = vrsqrt.f32 %v2902_v2  ;;  %vm2912_vm14 = vweird.f32 %v2902_v2  ;;  %vm2932_vm0 = vweird.f32 %v2904_v36 }
 0xb58   : > { %3794 = vrsqrt.f32 %v2904_v36 }
 0xb5a   : > { %v2897_v10 = vpop.xlane.xlu1 %2896  ;;  %v2893_v41 = vpop.xlane.xlu2 %2892 }
 0xb5b   : > { %v2901_v56 = vmul.f32 %v2897_v10, %v4087_v55  ;;  %v2899_v37 = vmul.f32 %v2893_v41, %v4087_v55 }
 0xb5d   : > { %v3793_v48 = vpop.eup %3792  ;;  %v2905_v15 = vadd.f32 1e-06, %v2901_v56  ;;  %v2903_v17 = vadd.f32 1e-06, %v2899_v37 }
 0xb5e   : > { %v3795_v13 = vpop.eup %3794  ;;  %v2907_v21 = vmul.f32 %v3793_v48, %v2902_v2  ;;  %vm2913_vm12 = vweird.f32 %v3793_v48 }
 0xb5f   : > { %v2927_v45 = vmul.f32 %v3795_v13, %v2904_v36  ;;  %3796 = vrsqrt.f32 %v2905_v15  ;;  %vm2933_vm13 = vweird.f32 %v3795_v13  ;;  %vm2914_vm15 = vmor %vm2912_vm14, %vm2913_vm12  ;;  %vm2942_vm4 = vweird.f32 %v2905_v15 }
 0xb60   : > { %v2908_v54 = vmul.f32 %v3793_v48, %v2907_v21  ;;  %3798 = vrsqrt.f32 %v2903_v17  ;;  %vm2934_vm1 = vmor %vm2932_vm0, %vm2933_vm13  ;;  %vm2922_vm6 = vweird.f32 %v2903_v17 }
 0xb61   : > { %v2928_v23 = vmul.f32 %v3795_v13, %v2927_v45 }
 0xb62   : > { %v2909_v12 = vmul.f32 0.5, %v2908_v54 }
 0xb63   : > { %v2929_v27 = vmul.f32 0.5, %v2928_v23 }
 0xb64   : > { %v2910_v28 = vsub.f32 1.5, %v2909_v12 }
 0xb65   : > { %v3797_v43 = vpop.eup %3796  ;;  %v2930_v32 = vsub.f32 1.5, %v2929_v27 }
 0xb66   : > { %v3799_v33 = vpop.eup %3798  ;;  %v2911_v46 = vmul.f32 %v3793_v48, %v2910_v28  ;;  %v2937_v55 = vmul.f32 %v3797_v43, %v2905_v15  ;;  %vm2943_vm2 = vweird.f32 %v3797_v43 }
 0xb67   : > { %v2931_v25 = vmul.f32 %v3795_v13, %v2930_v32  ;;  %v2917_v20 = vmul.f32 %v3799_v33, %v2903_v17  ;;  %vm2923_vm3 = vweird.f32 %v3799_v33  ;;  %vm2944_vm5 = vmor %vm2942_vm4, %vm2943_vm2 }
 0xb68   : > { %v2915_v8 = vsel %vm2914_vm15, %v3793_v48, %v2911_v46  ;;  %v2938_v59 = vmul.f32 %v3797_v43, %v2937_v55  ;;  %vm2924_vm7 = vmor %vm2922_vm6, %vm2923_vm3 }
 0xb69   : > { %v2946_v61 = vmul.f32 %v2915_v8, %v2882_v60  ;;  %v2935_v47 = vsel %vm2934_vm1, %v3795_v13, %v2931_v25  ;;  %v2918_v24 = vmul.f32 %v3799_v33, %v2917_v20 }
 0xb6a   : > { %v2948_v34 = vmul.f32 %v2935_v47, %v2884_v9  ;;  %v2939_v39 = vmul.f32 0.5, %v2938_v59 }
 0xb6b   : > { %v2953_v49 = vmul.f32 %v3790_v35, %v2946_v61  ;;  %v2919_v7 = vmul.f32 0.5, %v2918_v24 }
 0xb6c   : > { %v2955_v22 = vmul.f32 %v3790_v35, %v2948_v34  ;;  %v2940_v52 = vsub.f32 1.5, %v2939_v39 }
 0xb6d   : > { %v2960_v30 = vadd.f32 %v3791_v40, %v2953_v49  ;;  %v2920_v58 = vsub.f32 1.5, %v2919_v7 }
 0xb6e   : > { %v2962_v38 = vadd.f32 %v3791_v40, %v2955_v22  ;;  %v2941_v29 = vmul.f32 %v3797_v43, %v2940_v52 }
 0xb6f   : > { %2964 = vst [vmem:[#allocation3] sm:$0xff] %v2960_v30  ;;  %v2921_v51 = vmul.f32 %v3799_v33, %v2920_v58 }
 0xb70   : > { %2966 = vst [vmem:[#allocation3 + $0x10] sm:$0xff] %v2962_v38  ;;  %v2945_v16 = vsel %vm2944_vm5, %v3797_v43, %v2941_v29 }
 0xb71   : > { %v2949_v31 = vmul.f32 %v2945_v16, %v4603_v44  ;;  %v2925_v53 = vsel %vm2924_vm7, %v3799_v33, %v2921_v51 }
 0xb72   : > { %v2947_v57 = vmul.f32 %v2925_v53, %v4605_v4 }
 0xb73   : > { %v2956_v18 = vmul.f32 %v3790_v35, %v2949_v31 }
 0xb74   : > { %v2954_v26 = vmul.f32 %v3790_v35, %v2947_v57 }
 0xb75   : > { %v2963_v9 = vadd.f32 %v3791_v40, %v2956_v18 }
 0xb76   : > { %v2961_v60 = vadd.f32 %v3791_v40, %v2954_v26 }
 0xb77   : > { %2967 = vst [vmem:[#allocation3 + $0x18] sm:$0xff] %v2963_v9 }
 0xb78   : > { %2965 = vst [vmem:[#allocation3 + $0x8] sm:$0xff] %v2961_v60 }
 0xb79 PF: > { %p3574_p7 = scmp.eq.s32.totalorder %s3948_s28, 1  ;;  %s3844_s26 = smov [#allocation3]  }
 0xb7a   : > { %s2973_s25 = sshll.u32 %s3844_s26, 4  ;;  %s4677_s17 = sld [smem:[#allocation15_spill]]  ;;  %s2974_s25 = int_to_ptr.vmem [resolvable:$true] %s2973_s25 }
 0xb7b   : > { %s3845_s18 = smov 128   ;;  %s3846_s30 = smov 8  }
 0xb80   : > { %s2975_s27 = sshll.u32 %s4677_s17, 4  ;;  %s2976_s27 = int_to_ptr.hbm [resolvable:$true] %s2975_s27 }
 0xb81   : > { %3571 = dma.vmem_to_hbm [thread:$0]  (%p3574_p7), %s2974_s25, 512, %s2976_s27, [#allocation4], %s3845_s18, %s3845_s18, %s3846_s30  }
 0xb82   : > { %3833 = dma.done.wait (%p3574_p7), [#allocation4], 512  }
 0xb83   : > { %3835 = vsyncadd (%p3574_p7), [#allocation4], 4294966784 }
 0xb84 PF: > { %s4678_s19 = sld [smem:[#allocation6_spill]] }
 0xb8a   : > { %s29_s27 = sadd.s32 1, %s4678_s19  }
 0xb8b   : > { %p26_p8 = scmp.ge.s32.totalorder %s29_s27, 4  }
 0xb8d   :  { %28 = sbr.rel (!%p26_p8) target bundleno = 11 (0xb), region = 164 }
 0xb92   :  { %2992 = vsyncpa [#allocation4], 1 }
 0xb93   :  { %2994 = vsyncpa [#allocation4 + $0x1], 1 }

</bundles_post_ra>
